<compile_context>
chip_gen: v7x
topology: tpu7x:2x2x1
jax: 0.10.0
libtpu: 0.0.40
codegen_flags: <defaults>
</compile_context>

<pallas_src>
import functools

import jax
import jax.numpy as jnp
from jax import lax
from jax.experimental import pallas as pl
from jax.experimental.pallas import tpu as pltpu


def _cdiv(a, b):
    return -(-a // b)


def _round_up(a, b):
    return _cdiv(a, b) * b


# Row order of the packed (10, emb_pad) f32 bias / small-weight table.
_B1, _B13, _B2, _W4, _B4, _B6, _B7, _W5G, _W5L, _B5 = range(10)
_N_ROWS = 10


def qnet_kernel(xv_ref, ws_ref, w1_ref, w13_ref, sq_ref, rows_ref, out_ref, *,
                T, s3_chunk, g_sz):
    """One batch tile of bt samples, each an N-node graph.

    xv_ref:   (bt, N, nd_pad)   f32   node features (zero padded)
    ws_ref:   (bt, N, N)        f32   edge weights
    w1_ref:   (nd_pad, E)       bf16  theta1
    w13_ref:  (2E, E)           bf16  [theta1_extra ; theta3] stacked along K
    sq_ref:   (3, E, E)         bf16  theta2, theta6, theta7
    rows_ref: (10, E)           f32   biases + theta4 / theta5 rows
    out_ref:  (1, 1, bt*N)      f32   Q(s, a) per node (lane-dense slab)
    """
    f32, bf16 = jnp.float32, jnp.bfloat16
    bt, n, nd = xv_ref.shape
    emb = w1_ref.shape[1]
    m = bt * n
    n_groups = bt // g_sz
    gn = g_sz * n

    def row(i):                                   # (1, emb) f32 row, read at use
        return rows_ref[i:i + 1]

    # ---- s1_pre = relu(theta1(xv)), flattened over bt*N rows ----------------
    xv_flat = xv_ref[...].reshape(m, nd).astype(bf16)
    s1_pre = jnp.maximum(
        jnp.dot(xv_flat, w1_ref[...], preferred_element_type=f32) + row(_B1),
        0.0)

    # ---- s3_2[:, j, :] = sum_i relu(theta4(Ws[:, i, j])) --------------------
    ws = ws_ref[...]
    w4, b4 = row(_W4), row(_B4)
    s3_2 = jnp.zeros((bt, n, emb), f32)
    for c0 in range(0, n, s3_chunk):              # bounds the (bt,ci,n,E) temp
        ws_c = ws[:, c0:c0 + s3_chunk, :]
        # TODO(synk): on v6e/v7x this elementwise term could run in bf16 (2x
        # VALU) and pack 4 node columns per 128-lane vreg; kept f32 for v5e
        # portability and exact padding semantics.
        s3_2 = s3_2 + jnp.sum(jnp.maximum(ws_c[..., None] * w4 + b4, 0.0),
                              axis=1)

    # ---- fused theta1_extra + theta3: single (m, 2E) x (2E, E) matmul -------
    cat = jnp.concatenate(
        [s1_pre.astype(bf16), s3_2.reshape(m, emb).astype(bf16)], axis=-1)
    base = jnp.dot(cat, w13_ref[...], preferred_element_type=f32) + row(_B13)

    # ---- block-diagonal connectivity (built once, reused every round) -------
    conn = (ws > 0).astype(f32)                              # (bt, n, n)
    conn_t = jnp.tile(conn.reshape(n_groups, gn, n), (1, 1, g_sz))

    def block_id(x):             # x // n without vector integer division
        bid = jnp.zeros_like(x)
        for k in range(1, g_sz):
            bid = bid + (x >= k * n).astype(jnp.int32)
        return bid

    r_id = block_id(lax.broadcasted_iota(jnp.int32, (n_groups, gn, 1), 1))
    c_id = block_id(lax.broadcasted_iota(jnp.int32, (n_groups, 1, gn), 2))
    # off-diagonal (cross-sample) blocks are exactly zero -> no sample leakage
    bd = jnp.where(r_id == c_id, conn_t, 0.0).astype(bf16)  # (n_groups, gn, gn)

    # ---- T rounds of message passing: mu = relu(base + theta2(conn @ mu)) ---
    # Round 0 has mu == 0, so conn @ mu == 0 and s2 == b2 exactly.
    if T == 0:
        mu = jnp.zeros((m, emb), f32)
    else:
        mu = jnp.maximum(base + row(_B2), 0.0)
    for _ in range(max(T - 1, 0)):
        agg = jnp.einsum('gij,gjd->gid', bd,
                         mu.reshape(n_groups, gn, emb).astype(bf16),
                         preferred_element_type=f32).reshape(m, emb)
        s2 = jnp.dot(agg.astype(bf16), sq_ref[0],
                     preferred_element_type=f32) + row(_B2)
        mu = jnp.maximum(base + s2, 0.0)

    # ---- readout: theta5(relu(cat[theta6(sum_j mu), theta7(mu)])) -----------
    mu_sum = jnp.sum(mu.reshape(bt, n, emb), axis=1)          # (bt, emb)
    g_act = jnp.maximum(
        jnp.dot(mu_sum.astype(bf16), sq_ref[1], preferred_element_type=f32)
        + row(_B6), 0.0)
    # relu(broadcast(global)) @ w5g is a single scalar per sample.
    qg = jnp.sum(g_act * row(_W5G), axis=-1, keepdims=True)   # (bt, 1)
    l_act = jnp.maximum(
        jnp.dot(mu.astype(bf16), sq_ref[2], preferred_element_type=f32)
        + row(_B7), 0.0)
    ql = jnp.sum(l_act.reshape(bt, n, emb) * row(_W5L), axis=-1)   # (bt, n)
    q = ql + qg + rows_ref[_B5:_B5 + 1, 0:1]                  # (bt, n)

    # Lane-dense store: flatten (bt, n) -> (1, bt*n) using sublane slices +
    # lane-axis concat only (no generic minor-dim reshape in the kernel).
    q_flat = jnp.concatenate([q[b:b + 1, :] for b in range(bt)], axis=1)
    out_ref[0] = q_flat


def _pack_params(params, nd_pad, emb_pad):
    """Zero-pad to lane/sublane granules and pack into 4 slabs (bf16 matmuls)."""
    f32, bf16 = jnp.float32, jnp.bfloat16

    def pad2(a, r, c):
        a = jnp.asarray(a, f32)
        return jnp.pad(a, ((0, r - a.shape[0]), (0, c - a.shape[1])))

    def rowvec(a):
        a = jnp.asarray(a, f32).reshape(-1)
        return jnp.pad(a, (0, emb_pad - a.shape[0]))

    w1 = pad2(params["w1"], nd_pad, emb_pad).astype(bf16)
    # theta1_extra / theta3 fused: base = [relu(theta1(xv)), s3_2] @ [[w1e],[w3]]
    w13 = jnp.concatenate([pad2(params["w1e"], emb_pad, emb_pad),
                           pad2(params["w3"], emb_pad, emb_pad)],
                          axis=0).astype(bf16)
    sq = jnp.stack([pad2(params[k], emb_pad, emb_pad)
                    for k in ("w2", "w6", "w7")]).astype(bf16)
    b13 = (jnp.asarray(params["b1e"], f32).reshape(-1)
           + jnp.asarray(params["b3"], f32).reshape(-1))
    rows = jnp.stack([
        rowvec(params["b1"]), rowvec(b13), rowvec(params["b2"]),
        rowvec(params["w4"]), rowvec(params["b4"]),
        rowvec(params["b6"]), rowvec(params["b7"]),
        rowvec(params["w5g"]), rowvec(params["w5l"]), rowvec(params["b5"]),
    ])                                                         # (10, emb_pad) f32
    return w1, w13, sq, rows


def qnet_forward(xv, Ws, params, *, T=4):
    f32 = jnp.float32
    B, N, node_dim = xv.shape
    emb = params["w1"].shape[1]

    LANE, SUBLANE = 128, 8
    emb_pad = _round_up(emb, LANE)
    nd_pad = _round_up(node_dim, SUBLANE)     # sublane pad only: xv stays tiny

    # Generation-aware VMEM budget (64 MiB physical on v7x, 128 MiB v5e/v6e).
    try:
        vmem_cap = int(pltpu.get_tpu_info().vmem_capacity_bytes)
    except Exception:
        vmem_cap = 64 * 2 ** 20
    vmem_budget = (3 * vmem_cap) // 4         # headroom for compiler scratch

    def tile_plan(bt):
        """(vmem estimate, s3 chunk, block-diag group size) for a batch tile."""
        m = bt * N
        s3c = max(1, min(N, (2 * 2 ** 20) // max(1, 4 * bt * N * emb_pad)))
        g = min(bt, max(1, 256 // max(N, 1)))
        while bt % g:
            g -= 1
        gn = g * N
        est = (2 * 4 * bt * N * (nd_pad + N)          # double-buffered xv, Ws
               + 2 * 4 * m                            # output block
               + 2 * 2 * (nd_pad + 5 * emb_pad) * emb_pad   # bf16 weights x2 buf
               + 2 * 4 * _N_ROWS * emb_pad            # f32 bias rows x2 buf
               + 4 * m * emb_pad * 7                  # f32 activation working set
               + 2 * m * 2 * emb_pad                  # bf16 concat operand
               + (bt // g) * gn * gn * 10             # conn_t / mask / bd
               + 4 * bt * s3c * N * emb_pad)          # s3 chunk temporary
        return est, s3c, g

    # Batch tile: target ~512 flattened rows / step (amortize the ~0.35us
    # per-step overhead, fill the MXU), keep grid length >= 2 (v7x: both
    # TensorCores; v5e/v6e: DMA/compute overlap), stay inside the VMEM budget.
    bt = max(1, min(B, max(1, 512 // max(N, 1))))
    if B >= 2:
        bt = min(bt, _cdiv(B, 2))
    while bt > 1 and tile_plan(bt)[0] > vmem_budget:
        bt = _cdiv(bt, 2)
    est, s3_chunk, g_sz = tile_plan(bt)
    nb = _cdiv(B, bt)
    b_pad = nb * bt

    xv_p = jnp.pad(jnp.asarray(xv, f32),
                   ((0, b_pad - B), (0, 0), (0, nd_pad - node_dim)))
    ws_p = jnp.pad(jnp.asarray(Ws, f32), ((0, b_pad - B), (0, 0), (0, 0)))
    w1_p, w13_p, sq_p, rows_p = _pack_params(params, nd_pad, emb_pad)

    vmem_limit = int(min(vmem_budget, max(32 * 2 ** 20, 3 * est)))

    grid_spec = pltpu.PrefetchScalarGridSpec(
        num_scalar_prefetch=0,
        grid=(nb,),
        in_specs=[
            pl.BlockSpec((bt, N, nd_pad), lambda i: (i, 0, 0)),        # xv
            pl.BlockSpec((bt, N, N), lambda i: (i, 0, 0)),             # Ws
            pl.BlockSpec((nd_pad, emb_pad), lambda i: (0, 0)),         # theta1
            pl.BlockSpec((2 * emb_pad, emb_pad), lambda i: (0, 0)),    # [w1e; w3]
            pl.BlockSpec((3, emb_pad, emb_pad), lambda i: (0, 0, 0)),  # w2,w6,w7
            pl.BlockSpec((_N_ROWS, emb_pad), lambda i: (0, 0)),        # bias rows
        ],
        out_specs=pl.BlockSpec((1, 1, bt * N), lambda i: (i, 0, 0)),
    )

    out = pl.pallas_call(
        functools.partial(qnet_kernel, T=T, s3_chunk=s3_chunk, g_sz=g_sz),
        out_shape=jax.ShapeDtypeStruct((nb, 1, bt * N), f32),
        grid_spec=grid_spec,
        compiler_params=pltpu.CompilerParams(
            dimension_semantics=("parallel",),
            vmem_limit_bytes=vmem_limit),
    )(xv_p, ws_p, w1_p, w13_p, sq_p, rows_p)

    return out.reshape(b_pad, N)[:B]


def init_params(key, emb_dim, node_dim=5):
    """Deterministic synthetic weights, stored as (in, out) matrices."""
    ks = jax.random.split(key, 20)
    s = 0.1
    nrm = lambda k, shape: (s * jax.random.normal(k, shape)).astype(jnp.float32)
    return {
        "w1":  nrm(ks[0], (node_dim, emb_dim)), "b1":  nrm(ks[1], (1, emb_dim)),
        "w1e": nrm(ks[2], (emb_dim, emb_dim)),  "b1e": nrm(ks[3], (1, emb_dim)),
        "w2":  nrm(ks[4], (emb_dim, emb_dim)),  "b2":  nrm(ks[5], (1, emb_dim)),
        "w3":  nrm(ks[6], (emb_dim, emb_dim)),  "b3":  nrm(ks[7], (1, emb_dim)),
        "w4":  nrm(ks[8], (1, emb_dim)),        "b4":  nrm(ks[9], (1, emb_dim)),
        "w6":  nrm(ks[10], (emb_dim, emb_dim)), "b6":  nrm(ks[11], (1, emb_dim)),
        "w7":  nrm(ks[12], (emb_dim, emb_dim)), "b7":  nrm(ks[13], (1, emb_dim)),
        "w5g": nrm(ks[14], (emb_dim, 1)),       # theta5 weight, global half
        "w5l": nrm(ks[15], (emb_dim, 1)),       # theta5 weight, local half
        "b5":  nrm(ks[16], (1, 1)),
    }


def qnet_reference(xv, Ws, p, *, T=4):
    """Pure-JAX f32 reference mirroring the PyTorch forward."""
    B, N, _ = xv.shape
    emb = p["w1"].shape[1]
    conn = jnp.where(Ws > 0, jnp.ones_like(Ws), jnp.zeros_like(Ws))
    s1 = xv @ p["w1"] + p["b1"]
    s1 = jnp.maximum(s1, 0.0) @ p["w1e"] + p["b1e"]
    s3_1 = jnp.maximum(Ws[..., None] * p["w4"][None, None]
                       + p["b4"][None, None], 0.0)
    s3_2 = jnp.sum(s3_1, axis=1)
    s3 = s3_2 @ p["w3"] + p["b3"]
    mu = jnp.zeros((B, N, emb), jnp.float32)
    for _ in range(T):
        s2 = (conn @ mu) @ p["w2"] + p["b2"]
        mu = jnp.maximum(s1 + s2 + s3, 0.0)
    g = jnp.sum(mu, axis=1, keepdims=True) @ p["w6"] + p["b6"]
    g = jnp.broadcast_to(g, (B, N, emb))
    l = mu @ p["w7"] + p["b7"]
    q = (jnp.maximum(g, 0.0) @ p["w5g"]
         + jnp.maximum(l, 0.0) @ p["w5l"] + p["b5"])
    return q[:, :, 0]


if __name__ == "__main__":
    B, N, emb_dim, node_dim, T = 2, 16, 32, 5, 4
    key = jax.random.PRNGKey(0)
    k_xv, k_ws, k_p = jax.random.split(key, 3)

    xv = jax.random.normal(k_xv, (B, N, node_dim), dtype=jnp.float32)
    # sparse-ish nonnegative weight matrix (zeros => no edge)
    w_raw = jax.random.uniform(k_ws, (B, N, N), dtype=jnp.float32)
    Ws = jnp.where(w_raw > 0.5, w_raw, 0.0)

    params = init_params(k_p, emb_dim, node_dim)

    out = jax.block_until_ready(qnet_forward(xv, Ws, params, T=T))
    ref = qnet_reference(xv, Ws, params, T=T)

    assert out.shape == (B, N)
    # bf16 MXU operands with f32 accumulation -> compare with a normalized
    # max-error tolerance instead of exact f32 parity.
    denom = jnp.maximum(jnp.max(jnp.abs(ref)), 1.0)
    rel_err = float(jnp.max(jnp.abs(out - ref)) / denom)
    assert rel_err < 5e-2, f"normalized max error {rel_err}"
    print("KERNEL_OK")
</pallas_src>

<mosaic_0001>
module attributes {stable_mosaic.version = 11 : i64} {
  func.func @qnet_kernel(%arg0: i32, %arg1: memref<1x16x8xf32, #tpu.memory_space<vmem>>, %arg2: memref<1x16x16xf32, #tpu.memory_space<vmem>>, %arg3: memref<8x128xbf16, #tpu.memory_space<vmem>>, %arg4: memref<256x128xbf16, #tpu.memory_space<vmem>>, %arg5: memref<3x128x128xbf16, #tpu.memory_space<vmem>>, %arg6: memref<10x128xf32, #tpu.memory_space<vmem>>, %arg7: memref<1x1x16xf32, #tpu.memory_space<vmem>>) attributes {dimension_semantics = [#tpu.dimension_semantics<parallel>], iteration_bounds = array<i64: 2>, scalar_prefetch = 0 : i64, scratch_operands = 0 : i64, tpu.core_type = #tpu.core_type<tc>, window_params = [{transform_indices = @transform_0, window_bounds = array<i64: 1, 16, 8>}, {transform_indices = @transform_1, window_bounds = array<i64: 1, 16, 16>}, {pipeline_mode = #tpu.pipeline_mode<synchronous>, transform_indices = @transform_2, window_bounds = array<i64: 8, 128>}, {pipeline_mode = #tpu.pipeline_mode<synchronous>, transform_indices = @transform_3, window_bounds = array<i64: 256, 128>}, {pipeline_mode = #tpu.pipeline_mode<synchronous>, transform_indices = @transform_4, window_bounds = array<i64: 3, 128, 128>}, {pipeline_mode = #tpu.pipeline_mode<synchronous>, transform_indices = @transform_5, window_bounds = array<i64: 10, 128>}, {transform_indices = @transform_6, window_bounds = array<i64: 1, 1, 16>}]} {
    %c0 = arith.constant 0 : index
    %c0_0 = arith.constant 0 : index
    %c0_1 = arith.constant 0 : index
    %0 = vector.load %arg1[%c0, %c0_0, %c0_1] : memref<1x16x8xf32, #tpu.memory_space<vmem>>, vector<1x16x8xf32>
    %1 = vector.shape_cast %0 : vector<1x16x8xf32> to vector<16x8xf32>
    %2 = arith.truncf %1 : vector<16x8xf32> to vector<16x8xbf16>
    %c0_2 = arith.constant 0 : index
    %c0_3 = arith.constant 0 : index
    %3 = vector.load %arg3[%c0_2, %c0_3] : memref<8x128xbf16, #tpu.memory_space<vmem>>, vector<8x128xbf16>
    %cst = arith.constant dense<0.000000e+00> : vector<16x128xf32>
    %4 = tpu.matmul %2, %3, %cst {dimension_numbers = #tpu.dot_dimension_numbers<[1], [0], [0], [1], [0, 0, 1, 1], [], []>} : vector<16x8xbf16>, vector<8x128xbf16>, vector<16x128xf32> -> vector<16x128xf32>
    %c0_4 = arith.constant 0 : index
    %c0_5 = arith.constant 0 : index
    %5 = vector.load %arg6[%c0_4, %c0_5] : memref<10x128xf32, #tpu.memory_space<vmem>>, vector<1x128xf32>
    %6 = vector.broadcast %5 : vector<1x128xf32> to vector<16x128xf32>
    %7 = arith.addf %4, %6 : vector<16x128xf32>
    %cst_6 = arith.constant 0.000000e+00 : f32
    %8 = vector.broadcast %cst_6 : f32 to vector<16x128xf32>
    %9 = arith.maximumf %7, %8 : vector<16x128xf32>
    %c0_7 = arith.constant 0 : index
    %c0_8 = arith.constant 0 : index
    %c0_9 = arith.constant 0 : index
    %10 = vector.load %arg2[%c0_7, %c0_8, %c0_9] : memref<1x16x16xf32, #tpu.memory_space<vmem>>, vector<1x16x16xf32>
    %c3 = arith.constant 3 : index
    %c0_10 = arith.constant 0 : index
    %11 = vector.load %arg6[%c3, %c0_10] : memref<10x128xf32, #tpu.memory_space<vmem>>, vector<1x128xf32>
    %c4 = arith.constant 4 : index
    %c0_11 = arith.constant 0 : index
    %12 = vector.load %arg6[%c4, %c0_11] : memref<10x128xf32, #tpu.memory_space<vmem>>, vector<1x128xf32>
    %cst_12 = arith.constant 0.000000e+00 : f32
    %13 = vector.broadcast %cst_12 : f32 to vector<1x16x128xf32>
    %14 = vector.shape_cast %10 : vector<1x16x16xf32> to vector<1x16x16x1xf32>
    %15 = vector.shape_cast %11 : vector<1x128xf32> to vector<1x1x1x128xf32>
    %16 = vector.broadcast %14 : vector<1x16x16x1xf32> to vector<1x16x16x128xf32>
    %17 = vector.broadcast %15 : vector<1x1x1x128xf32> to vector<1x16x16x128xf32>
    %18 = arith.mulf %16, %17 : vector<1x16x16x128xf32>
    %19 = vector.shape_cast %12 : vector<1x128xf32> to vector<1x1x1x128xf32>
    %20 = vector.broadcast %19 : vector<1x1x1x128xf32> to vector<1x16x16x128xf32>
    %21 = arith.addf %18, %20 : vector<1x16x16x128xf32>
    %cst_13 = arith.constant 0.000000e+00 : f32
    %22 = vector.broadcast %cst_13 : f32 to vector<1x16x16x128xf32>
    %23 = arith.maximumf %21, %22 : vector<1x16x16x128xf32>
    %cst_14 = arith.constant dense<0.000000e+00> : vector<1x16x128xf32>
    %24 = vector.multi_reduction <add>, %23, %cst_14 [1] : vector<1x16x16x128xf32> to vector<1x16x128xf32>
    %25 = arith.addf %13, %24 : vector<1x16x128xf32>
    %26 = arith.truncf %9 : vector<16x128xf32> to vector<16x128xbf16>
    %27 = vector.shape_cast %25 : vector<1x16x128xf32> to vector<16x128xf32>
    %28 = arith.truncf %27 : vector<16x128xf32> to vector<16x128xbf16>
    %29 = tpu.concatenate %26, %28 in 1 : vector<16x128xbf16>, vector<16x128xbf16> -> vector<16x256xbf16>
    %c0_15 = arith.constant 0 : index
    %c0_16 = arith.constant 0 : index
    %30 = vector.load %arg4[%c0_15, %c0_16] : memref<256x128xbf16, #tpu.memory_space<vmem>>, vector<256x128xbf16>
    %cst_17 = arith.constant dense<0.000000e+00> : vector<16x128xf32>
    %31 = tpu.matmul %29, %30, %cst_17 {dimension_numbers = #tpu.dot_dimension_numbers<[1], [0], [0], [1], [0, 0, 1, 1], [], []>} : vector<16x256xbf16>, vector<256x128xbf16>, vector<16x128xf32> -> vector<16x128xf32>
    %c1 = arith.constant 1 : index
    %c0_18 = arith.constant 0 : index
    %32 = vector.load %arg6[%c1, %c0_18] : memref<10x128xf32, #tpu.memory_space<vmem>>, vector<1x128xf32>
    %33 = vector.broadcast %32 : vector<1x128xf32> to vector<16x128xf32>
    %34 = arith.addf %31, %33 : vector<16x128xf32>
    %cst_19 = arith.constant 0.000000e+00 : f32
    %35 = vector.broadcast %cst_19 : f32 to vector<1x16x16xf32>
    %36 = arith.cmpf ogt, %10, %35 : vector<1x16x16xf32>
    %37 = arith.extui %36 : vector<1x16x16xi1> to vector<1x16x16xi32>
    %38 = arith.sitofp %37 : vector<1x16x16xi32> to vector<1x16x16xf32>
    %c0_i32 = arith.constant 0 : i32
    %39 = vector.broadcast %c0_i32 : i32 to vector<1x16x1xi32>
    %c0_i32_20 = arith.constant 0 : i32
    %40 = vector.broadcast %c0_i32_20 : i32 to vector<1x1x16xi32>
    %41 = vector.broadcast %39 : vector<1x16x1xi32> to vector<1x16x16xi32>
    %42 = vector.broadcast %40 : vector<1x1x16xi32> to vector<1x16x16xi32>
    %43 = arith.cmpi eq, %41, %42 : vector<1x16x16xi32>
    %cst_21 = arith.constant 0.000000e+00 : f32
    %44 = vector.broadcast %cst_21 : f32 to vector<1x16x16xf32>
    %45 = arith.select %43, %38, %44 : vector<1x16x16xi1>, vector<1x16x16xf32>
    %46 = arith.truncf %45 : vector<1x16x16xf32> to vector<1x16x16xbf16>
    %c2 = arith.constant 2 : index
    %c0_22 = arith.constant 0 : index
    %47 = vector.load %arg6[%c2, %c0_22] : memref<10x128xf32, #tpu.memory_space<vmem>>, vector<1x128xf32>
    %48 = vector.broadcast %47 : vector<1x128xf32> to vector<16x128xf32>
    %49 = arith.addf %34, %48 : vector<16x128xf32>
    %cst_23 = arith.constant 0.000000e+00 : f32
    %50 = vector.broadcast %cst_23 : f32 to vector<16x128xf32>
    %51 = arith.maximumf %49, %50 : vector<16x128xf32>
    %52 = vector.shape_cast %51 : vector<16x128xf32> to vector<1x16x128xf32>
    %53 = arith.truncf %52 : vector<1x16x128xf32> to vector<1x16x128xbf16>
    "tpu.trace_start"() <{level = 10 : i32, message = "gij,gjd->gid"}> : () -> ()
    %cst_24 = arith.constant dense<0.000000e+00> : vector<1x16x128xf32>
    %54 = tpu.matmul %46, %53, %cst_24 {dimension_numbers = #tpu.dot_dimension_numbers<[2], [1], [1], [2], [0, 0, 0, 1, 1, 2], [0], [0]>} : vector<1x16x16xbf16>, vector<1x16x128xbf16>, vector<1x16x128xf32> -> vector<1x16x128xf32>
    "tpu.trace_stop"() : () -> ()
    %55 = vector.shape_cast %54 : vector<1x16x128xf32> to vector<16x128xf32>
    %56 = arith.truncf %55 : vector<16x128xf32> to vector<16x128xbf16>
    %c0_25 = arith.constant 0 : index
    %c0_26 = arith.constant 0 : index
    %c0_27 = arith.constant 0 : index
    %57 = vector.load %arg5[%c0_25, %c0_26, %c0_27] : memref<3x128x128xbf16, #tpu.memory_space<vmem>>, vector<1x128x128xbf16>
    %58 = vector.shape_cast %57 : vector<1x128x128xbf16> to vector<128x128xbf16>
    %cst_28 = arith.constant dense<0.000000e+00> : vector<16x128xf32>
    %59 = tpu.matmul %56, %58, %cst_28 {dimension_numbers = #tpu.dot_dimension_numbers<[1], [0], [0], [1], [0, 0, 1, 1], [], []>} : vector<16x128xbf16>, vector<128x128xbf16>, vector<16x128xf32> -> vector<16x128xf32>
    %c2_29 = arith.constant 2 : index
    %c0_30 = arith.constant 0 : index
    %60 = vector.load %arg6[%c2_29, %c0_30] : memref<10x128xf32, #tpu.memory_space<vmem>>, vector<1x128xf32>
    %61 = vector.broadcast %60 : vector<1x128xf32> to vector<16x128xf32>
    %62 = arith.addf %59, %61 : vector<16x128xf32>
    %63 = arith.addf %34, %62 : vector<16x128xf32>
    %cst_31 = arith.constant 0.000000e+00 : f32
    %64 = vector.broadcast %cst_31 : f32 to vector<16x128xf32>
    %65 = arith.maximumf %63, %64 : vector<16x128xf32>
    %66 = vector.shape_cast %65 : vector<16x128xf32> to vector<1x16x128xf32>
    %67 = arith.truncf %66 : vector<1x16x128xf32> to vector<1x16x128xbf16>
    "tpu.trace_start"() <{level = 10 : i32, message = "gij,gjd->gid"}> : () -> ()
    %cst_32 = arith.constant dense<0.000000e+00> : vector<1x16x128xf32>
    %68 = tpu.matmul %46, %67, %cst_32 {dimension_numbers = #tpu.dot_dimension_numbers<[2], [1], [1], [2], [0, 0, 0, 1, 1, 2], [0], [0]>} : vector<1x16x16xbf16>, vector<1x16x128xbf16>, vector<1x16x128xf32> -> vector<1x16x128xf32>
    "tpu.trace_stop"() : () -> ()
    %69 = vector.shape_cast %68 : vector<1x16x128xf32> to vector<16x128xf32>
    %70 = arith.truncf %69 : vector<16x128xf32> to vector<16x128xbf16>
    %c0_33 = arith.constant 0 : index
    %c0_34 = arith.constant 0 : index
    %c0_35 = arith.constant 0 : index
    %71 = vector.load %arg5[%c0_33, %c0_34, %c0_35] : memref<3x128x128xbf16, #tpu.memory_space<vmem>>, vector<1x128x128xbf16>
    %72 = vector.shape_cast %71 : vector<1x128x128xbf16> to vector<128x128xbf16>
    %cst_36 = arith.constant dense<0.000000e+00> : vector<16x128xf32>
    %73 = tpu.matmul %70, %72, %cst_36 {dimension_numbers = #tpu.dot_dimension_numbers<[1], [0], [0], [1], [0, 0, 1, 1], [], []>} : vector<16x128xbf16>, vector<128x128xbf16>, vector<16x128xf32> -> vector<16x128xf32>
    %c2_37 = arith.constant 2 : index
    %c0_38 = arith.constant 0 : index
    %74 = vector.load %arg6[%c2_37, %c0_38] : memref<10x128xf32, #tpu.memory_space<vmem>>, vector<1x128xf32>
    %75 = vector.broadcast %74 : vector<1x128xf32> to vector<16x128xf32>
    %76 = arith.addf %73, %75 : vector<16x128xf32>
    %77 = arith.addf %34, %76 : vector<16x128xf32>
    %cst_39 = arith.constant 0.000000e+00 : f32
    %78 = vector.broadcast %cst_39 : f32 to vector<16x128xf32>
    %79 = arith.maximumf %77, %78 : vector<16x128xf32>
    %80 = vector.shape_cast %79 : vector<16x128xf32> to vector<1x16x128xf32>
    %81 = arith.truncf %80 : vector<1x16x128xf32> to vector<1x16x128xbf16>
    "tpu.trace_start"() <{level = 10 : i32, message = "gij,gjd->gid"}> : () -> ()
    %cst_40 = arith.constant dense<0.000000e+00> : vector<1x16x128xf32>
    %82 = tpu.matmul %46, %81, %cst_40 {dimension_numbers = #tpu.dot_dimension_numbers<[2], [1], [1], [2], [0, 0, 0, 1, 1, 2], [0], [0]>} : vector<1x16x16xbf16>, vector<1x16x128xbf16>, vector<1x16x128xf32> -> vector<1x16x128xf32>
    "tpu.trace_stop"() : () -> ()
    %83 = vector.shape_cast %82 : vector<1x16x128xf32> to vector<16x128xf32>
    %84 = arith.truncf %83 : vector<16x128xf32> to vector<16x128xbf16>
    %c0_41 = arith.constant 0 : index
    %c0_42 = arith.constant 0 : index
    %c0_43 = arith.constant 0 : index
    %85 = vector.load %arg5[%c0_41, %c0_42, %c0_43] : memref<3x128x128xbf16, #tpu.memory_space<vmem>>, vector<1x128x128xbf16>
    %86 = vector.shape_cast %85 : vector<1x128x128xbf16> to vector<128x128xbf16>
    %cst_44 = arith.constant dense<0.000000e+00> : vector<16x128xf32>
    %87 = tpu.matmul %84, %86, %cst_44 {dimension_numbers = #tpu.dot_dimension_numbers<[1], [0], [0], [1], [0, 0, 1, 1], [], []>} : vector<16x128xbf16>, vector<128x128xbf16>, vector<16x128xf32> -> vector<16x128xf32>
    %c2_45 = arith.constant 2 : index
    %c0_46 = arith.constant 0 : index
    %88 = vector.load %arg6[%c2_45, %c0_46] : memref<10x128xf32, #tpu.memory_space<vmem>>, vector<1x128xf32>
    %89 = vector.broadcast %88 : vector<1x128xf32> to vector<16x128xf32>
    %90 = arith.addf %87, %89 : vector<16x128xf32>
    %91 = arith.addf %34, %90 : vector<16x128xf32>
    %cst_47 = arith.constant 0.000000e+00 : f32
    %92 = vector.broadcast %cst_47 : f32 to vector<16x128xf32>
    %93 = arith.maximumf %91, %92 : vector<16x128xf32>
    %94 = vector.shape_cast %93 : vector<16x128xf32> to vector<1x16x128xf32>
    %cst_48 = arith.constant dense<0.000000e+00> : vector<1x128xf32>
    %95 = vector.multi_reduction <add>, %94, %cst_48 [1] : vector<1x16x128xf32> to vector<1x128xf32>
    %96 = arith.truncf %95 : vector<1x128xf32> to vector<1x128xbf16>
    %c1_49 = arith.constant 1 : index
    %c0_50 = arith.constant 0 : index
    %c0_51 = arith.constant 0 : index
    %97 = vector.load %arg5[%c1_49, %c0_50, %c0_51] : memref<3x128x128xbf16, #tpu.memory_space<vmem>>, vector<1x128x128xbf16>
    %98 = vector.shape_cast %97 : vector<1x128x128xbf16> to vector<128x128xbf16>
    %cst_52 = arith.constant dense<0.000000e+00> : vector<1x128xf32>
    %99 = tpu.matmul %96, %98, %cst_52 {dimension_numbers = #tpu.dot_dimension_numbers<[1], [0], [0], [1], [0, 0, 1, 1], [], []>} : vector<1x128xbf16>, vector<128x128xbf16>, vector<1x128xf32> -> vector<1x128xf32>
    %c5 = arith.constant 5 : index
    %c0_53 = arith.constant 0 : index
    %100 = vector.load %arg6[%c5, %c0_53] : memref<10x128xf32, #tpu.memory_space<vmem>>, vector<1x128xf32>
    %101 = arith.addf %99, %100 : vector<1x128xf32>
    %cst_54 = arith.constant 0.000000e+00 : f32
    %102 = vector.broadcast %cst_54 : f32 to vector<1x128xf32>
    %103 = arith.maximumf %101, %102 : vector<1x128xf32>
    %c7 = arith.constant 7 : index
    %c0_55 = arith.constant 0 : index
    %104 = vector.load %arg6[%c7, %c0_55] : memref<10x128xf32, #tpu.memory_space<vmem>>, vector<1x128xf32>
    %105 = arith.mulf %103, %104 : vector<1x128xf32>
    %cst_56 = arith.constant dense<0.000000e+00> : vector<1xf32>
    %106 = vector.multi_reduction <add>, %105, %cst_56 [1] : vector<1x128xf32> to vector<1xf32>
    %107 = vector.shape_cast %106 : vector<1xf32> to vector<1x1xf32>
    %108 = arith.truncf %93 : vector<16x128xf32> to vector<16x128xbf16>
    %c2_57 = arith.constant 2 : index
    %c0_58 = arith.constant 0 : index
    %c0_59 = arith.constant 0 : index
    %109 = vector.load %arg5[%c2_57, %c0_58, %c0_59] : memref<3x128x128xbf16, #tpu.memory_space<vmem>>, vector<1x128x128xbf16>
    %110 = vector.shape_cast %109 : vector<1x128x128xbf16> to vector<128x128xbf16>
    %cst_60 = arith.constant dense<0.000000e+00> : vector<16x128xf32>
    %111 = tpu.matmul %108, %110, %cst_60 {dimension_numbers = #tpu.dot_dimension_numbers<[1], [0], [0], [1], [0, 0, 1, 1], [], []>} : vector<16x128xbf16>, vector<128x128xbf16>, vector<16x128xf32> -> vector<16x128xf32>
    %c6 = arith.constant 6 : index
    %c0_61 = arith.constant 0 : index
    %112 = vector.load %arg6[%c6, %c0_61] : memref<10x128xf32, #tpu.memory_space<vmem>>, vector<1x128xf32>
    %113 = vector.broadcast %112 : vector<1x128xf32> to vector<16x128xf32>
    %114 = arith.addf %111, %113 : vector<16x128xf32>
    %cst_62 = arith.constant 0.000000e+00 : f32
    %115 = vector.broadcast %cst_62 : f32 to vector<16x128xf32>
    %116 = arith.maximumf %114, %115 : vector<16x128xf32>
    %117 = vector.shape_cast %116 : vector<16x128xf32> to vector<1x16x128xf32>
    %c8 = arith.constant 8 : index
    %c0_63 = arith.constant 0 : index
    %118 = vector.load %arg6[%c8, %c0_63] : memref<10x128xf32, #tpu.memory_space<vmem>>, vector<1x128xf32>
    %119 = vector.shape_cast %118 : vector<1x128xf32> to vector<1x1x128xf32>
    %120 = vector.broadcast %119 : vector<1x1x128xf32> to vector<1x16x128xf32>
    %121 = arith.mulf %117, %120 : vector<1x16x128xf32>
    %cst_64 = arith.constant dense<0.000000e+00> : vector<1x16xf32>
    %122 = vector.multi_reduction <add>, %121, %cst_64 [2] : vector<1x16x128xf32> to vector<1x16xf32>
    %123 = vector.broadcast %107 : vector<1x1xf32> to vector<1x16xf32>
    %124 = arith.addf %122, %123 : vector<1x16xf32>
    %c9 = arith.constant 9 : index
    %c0_65 = arith.constant 0 : index
    %125 = vector.load %arg6[%c9, %c0_65] : memref<10x128xf32, #tpu.memory_space<vmem>>, vector<1x1xf32>
    %126 = vector.broadcast %125 : vector<1x1xf32> to vector<1x16xf32>
    %127 = arith.addf %124, %126 : vector<1x16xf32>
    %c0_66 = arith.constant 0 : index
    %c0_67 = arith.constant 0 : index
    %c0_68 = arith.constant 0 : index
    %128 = vector.load %arg7[%c0_66, %c0_67, %c0_68] : memref<1x1x16xf32, #tpu.memory_space<vmem>>, vector<1x1x16xf32>
    %129 = vector.shape_cast %128 : vector<1x1x16xf32> to vector<1x16xf32>
    %130 = vector.shape_cast %127 : vector<1x16xf32> to vector<1x1x16xf32>
    tpu.vector_store %arg7[%c0_66, %c0_67, %c0_68], %130 {strides = array<i32>} : memref<1x1x16xf32, #tpu.memory_space<vmem>>, vector<1x1x16xf32>,
    return
  }
  func.func @transform_0(%arg0: i32) -> (i32, i32, i32) {
    %c0_i32 = arith.constant 0 : i32
    %c0_i32_0 = arith.constant 0 : i32
    %c0_i32_1 = arith.constant 0 : i32
    return %arg0, %c0_i32, %c0_i32_0 : i32, i32, i32
  }
  func.func @transform_1(%arg0: i32) -> (i32, i32, i32) {
    %c0_i32 = arith.constant 0 : i32
    %c0_i32_0 = arith.constant 0 : i32
    %c0_i32_1 = arith.constant 0 : i32
    return %arg0, %c0_i32, %c0_i32_0 : i32, i32, i32
  }
  func.func @transform_2(%arg0: i32) -> (i32, i32) {
    %c0_i32 = arith.constant 0 : i32
    %c0_i32_0 = arith.constant 0 : i32
    %c0_i32_1 = arith.constant 0 : i32
    return %c0_i32, %c0_i32_0 : i32, i32
  }
  func.func @transform_3(%arg0: i32) -> (i32, i32) {
    %c0_i32 = arith.constant 0 : i32
    %c0_i32_0 = arith.constant 0 : i32
    %c0_i32_1 = arith.constant 0 : i32
    return %c0_i32, %c0_i32_0 : i32, i32
  }
  func.func @transform_4(%arg0: i32) -> (i32, i32, i32) {
    %c0_i32 = arith.constant 0 : i32
    %c0_i32_0 = arith.constant 0 : i32
    %c0_i32_1 = arith.constant 0 : i32
    %c0_i32_2 = arith.constant 0 : i32
    return %c0_i32, %c0_i32_0, %c0_i32_1 : i32, i32, i32
  }
  func.func @transform_5(%arg0: i32) -> (i32, i32) {
    %c0_i32 = arith.constant 0 : i32
    %c0_i32_0 = arith.constant 0 : i32
    %c0_i32_1 = arith.constant 0 : i32
    return %c0_i32, %c0_i32_0 : i32, i32
  }
  func.func @transform_6(%arg0: i32) -> (i32, i32, i32) {
    %c0_i32 = arith.constant 0 : i32
    %c0_i32_0 = arith.constant 0 : i32
    %c0_i32_1 = arith.constant 0 : i32
    return %arg0, %c0_i32, %c0_i32_0 : i32, i32, i32
  }
}

</mosaic_0001>

<bundles_post_ra>
// kernel: tpu_custom_call.1
= control target key start
LH: loop header
LB: loop body
LE: loop exit
PB: predicated region body
PF: predicated region fallthrough
CT: control target
= control target key end

     0   :  { %11 = vsyncpa [#allocation3], 0  ;;  %s2734_s0 = inlined_call_operand.vmem [shape: f32[2,16,8], index: 0, kind: input, shape index: {}]   ;;  %s2735_s1 = inlined_call_operand.vmem [shape: f32[2,16,16], index: 1, kind: input, shape index: {}]   ;;  %s2736_s2 = inlined_call_operand.vmem [shape: bf16[8,128], index: 2, kind: input, shape index: {}]   ;;  %s2737_s3 = inlined_call_operand.hbm [shape: bf16[256,128], index: 3, kind: input, shape index: {}]   ;;  %s2738_s4 = inlined_call_operand.hbm [shape: bf16[3,128,128], index: 4, kind: input, shape index: {}]   ;;  %s2739_s5 = inlined_call_operand.vmem [shape: f32[10,128], index: 5, kind: input, shape index: {}]   ;;  %s2740_s6 = inlined_call_operand.hbm [shape: f32[2,1,16], index: 6, kind: output, shape index: {}]  }
   0x1   :  { %12 = vsyncpa [#allocation6], 0 }
   0x2   :  { %13 = vsyncpa [#allocation4], 0 }
   0x3   :  { %15 = vsyncpa [#allocation4 + $0x1], 0  ;;  %s2317_s21 = smov 0   ;;  %s2319_s22 = smov 0  }
   0x4   :  { %s2321_s23 = smov 0   ;;  %s2323_s24 = smov 0  }
   0x5 LB: > { %s2338_s25 = sadd.s32 4294967295, %s2272_s24   ;;  %s1735_s26 = sadd.s32 4294967294, %s2272_s24   ;;  %s2272_s24 = sphi %s2323_s24, %s2758_s24   ;;  %s2268_s23 = sphi %s2321_s23, %s2757_s23   ;;  %s2264_s22 = sphi %s2319_s22, %s2756_s22   ;;  %s2260_s21 = sphi %s2317_s21, %s2755_s21  }
   0x6   : > { %s2342_s27 = sadd.s32 1, %s2272_s24   ;;  %s164_s28 = sadd.s32 1, %s2268_s23 }
   0x7   : > { %s161_s29 = ssub.s32 %s2272_s24, %s2342_s27  ;;  %p174_p0 = scmp.ne.s32.totalorder %s2268_s23, %s2264_s22 }
   0x8   : > { %p162_p1 = scmp.eq.s32.totalorder %s161_s29, 0  ;;  %p175_p2 = scmp.eq.s32.totalorder %s2338_s25, 1 }
   0x9   : > { %p180_p3 = scmp.ne.s32.totalorder %s2264_s22, %s2260_s21  ;;  %p181_p4 = scmp.eq.s32.totalorder %s1735_s26, 1 }
   0xa   : > { %s2353_s30 = scalar_select %p162_p1, %s2268_s23, %s164_s28  }
   0xb   : > { %p2355_p5 = por %p175_p2, %p174_p0  ;;  %p2359_p6 = por %p181_p4, %p180_p3 }
   0xc   : > { %p1736_p7 = scmp.ge.s32.totalorder %s2272_s24, 1  ;;  %p188_p8 = scmp.lt.s32.totalorder %s2272_s24, 3 }
   0xd   : > { %s2744_s7 = scalar_select %p2355_p5, 1, 0 }
   0xe   : > { %s2745_s8 = scalar_select %p2359_p6, 1, 0 }
   0xf   : > { %p2741_p9 = scmp.eq.s32.totalorder %s2338_s25, 0  ;;  %p2366_p10 = pnand %p1736_p7, %p188_p8 }
  0x10   : > { %s2274_s10 = smov [#allocation2]   ;;  %s2275_s13 = smov [#allocation5]  }
  0x11   : > { %s2746_s9 = scalar_select %p2366_p10, 1, 0 }
  0x12   : > { %s203_s11 = sshll.u32 %s2274_s10, 4  ;;  %p2033_p11 = pneg %p2366_p10  ;;  %s204_s11 = int_to_ptr.vmem [resolvable:$true] %s203_s11 }
  0x13   : > { %s216_s14 = sshll.u32 %s2275_s13, 4  ;;  %s2146_s17 = scalar_lea.hbm %s2737_s3, 2048  ;;  %s2378_s14 = int_to_ptr.vmem [resolvable:$true] %s216_s14 }
  0x14   : > { %p2374_p12 = pnand %p2741_p9, %p2033_p11  ;;  %p2147_p13 = scmp.ne.s32.totalorder %s2737_s3, %s2146_s17 }
  0x15   : > { %p2153_p3 = scmp.lt.u32.totalorder %s2146_s17, %s2737_s3 }
  0x16   : > { %p2148_p0 = pneg %p2374_p12 }
  0x18   : > { %p2149_p1 = pnand %p2148_p0, %p2147_p13 }
  0x1a   : > { %p2150_p2 = pneg %p2149_p1 }
  0x1c   : > { %p2155_p4 = pnand %p2153_p3, %p2150_p2 }
  0x1e   : > { %2158 = shalt.err (!%p2155_p4)
}
  0x1f   : > { %s2159_s28 = scalar_lea.vmem %s204_s11, 2048  ;;  %p2167_p9 = scmp.lt.s32.totalorder %s204_s11, %s204_s11 }
  0x20   : > { %p2160_p7 = scmp.ne.s32.totalorder %s204_s11, %s2159_s28  ;;  %p2168_p6 = scmp.lt.s32.totalorder %s2159_s28, %s2159_s28 }
  0x22   : > { %p2162_p8 = pnand %p2160_p7, %p2148_p0  ;;  %p2169_p5 = por %p2168_p6, %p2167_p9 }
  0x24   : > { %p2163_p11 = pneg %p2162_p8 }
  0x26   : > { %p2170_p10 = pnand %p2169_p5, %p2163_p11 }
  0x28   : > { %2173 = shalt.err (!%p2170_p10)
}
  0x29   : > { %s2276_s29 = smov 64   ;;  %s2277_s10 = smov 4  }
  0x2a   : > { %2036 = dma.hbm_to_vmem [thread:$0]  (!%p2374_p12), %s2737_s3, 2048, %s204_s11, [#allocation3], %s2276_s29, %s2276_s29, %s2277_s10  }
  0x2b   : > { %s2174_s18 = scalar_lea.hbm %s2738_s4, 3072 }
  0x2c   : > { %p2175_p13 = scmp.ne.s32.totalorder %s2738_s4, %s2174_s18  ;;  %p2181_p9 = scmp.lt.u32.totalorder %s2174_s18, %s2738_s4 }
  0x2e   : > { %p2177_p5 = pnand %p2175_p13, %p2148_p0 }
  0x30   : > { %p2178_p6 = pneg %p2177_p5 }
  0x32   : > { %p2183_p10 = pnand %p2181_p9, %p2178_p6 }
  0x34   : > { %2186 = shalt.err (!%p2183_p10)
}
  0x35   : > { %s2187_s11 = scalar_lea.vmem %s2378_s14, 3072  ;;  %p2195_p4 = scmp.lt.s32.totalorder %s2378_s14, %s2378_s14 }
  0x36   : > { %p2188_p1 = scmp.ne.s32.totalorder %s2378_s14, %s2187_s11  ;;  %p2196_p7 = scmp.lt.s32.totalorder %s2187_s11, %s2187_s11 }
  0x38   : > { %p2190_p2 = pnand %p2188_p1, %p2148_p0  ;;  %p2197_p8 = por %p2196_p7, %p2195_p4 }
  0x3a   : > { %p2191_p3 = pneg %p2190_p2 }
  0x3c   : > { %p2198_p11 = pnand %p2197_p8, %p2191_p3 }
  0x3e   : > { %2201 = shalt.err (!%p2198_p11)
}
  0x3f   : > { %2039 = dma.hbm_to_vmem [thread:$0]  (!%p2374_p12), %s2738_s4, 3072, %s2378_s14, [#allocation6], %s2276_s29, %s2276_s29, %s2277_s10  }
  0x40   : > { %p2748_p13 = scmp.ne.s32.totalorder %s2746_s9, 0 }
  0x41   : > { %p2749_p5 = scmp.eq.s32.totalorder (!%p2748_p13), %s2338_s25, 0 }
  0x42   : > { %251 = sbr.rel (%p2748_p13) target bundleno = 2391 (0x957), region = 44 }
  0x49   : > { %2247 = dma.done.wait (%p2749_p5), [#allocation3], 2048   ;;  %p2750_p0 = pmov %p2749_p5 }
  0x4b   : > { %2249 = vsyncadd (%p2750_p0), [#allocation3], 4294965248  ;;  %p2751_p6 = pmov %p2750_p0 }
  0x4c   : > { %p2752_p9 = pmov %p2750_p0 }
  0x4d   : > { %2251 = dma.done.wait (%p2751_p6), [#allocation6], 3072  }
  0x4e   : > { %2253 = vsyncadd (%p2752_p9), [#allocation6], 4294964224  ;;  %p289_p10 = scmp.lt.s32.totalorder %s2338_s25, 1  ;;  %v364_v0 = vlaneseq  ;;  %v2278_v1 = vmov 0.0   ;;  %vm2279_vm0 = vmmov 0   ;;  %vm313_vm1 = vcmask 1043456  }
  0x4f   : > { %1899 = vmatprep.subr.bf16.mxu1 %v2278_v1  ;;  %1901 = vmatprep.mubr.msk.bf16.mxu1 %vm2279_vm0, %v2278_v1  ;;  %vm309_vm2 = vcmask 64512   ;;  %v303_v5 = vld [vmem:[%s2736_s2] sm:$0xf]  ;;  %v2092_v36 = vld [vmem:[#allocation2 + $0x48] sm:$0xff]   ;;  %v2094_v38 = vld [vmem:[#allocation2 + $0x50] sm:$0xff]   ;;  %vm869_vm5 = vcmask 130048  }
  0x50   : > { %s290_s9 = scalar_select %p289_p10, %s2338_s25, 1  ;;  %v2443_v2 = vshrl.u32 %v364_v0, 7  ;;  %1905 = vmatprep.subr.bf16.mxu0 %v2278_v1  ;;  %1907 = vmatprep.mubr.msk.bf16.mxu0 %vm2279_vm0, %v2278_v1  ;;  %v315_v10 = vsel %vm313_vm1, %v303_v5, 0  ;;  %v2090_v34 = vld [vmem:[#allocation2 + $0x40] sm:$0xff]   ;;  %v2093_v37 = vld [vmem:[#allocation2 + $0x8] sm:$0xff]   ;;  %v2095_v39 = vld [vmem:[#allocation2 + $0x10] sm:$0xff]  }
  0x51   : > { %1900 = vmatpush3.bf16.msra.mxu1 %v315_v10  ;;  %v2091_v35 = vld [vmem:[#allocation2] sm:$0xff]   ;;  %v2096_v40 = vld [vmem:[#allocation2 + $0x58] sm:$0xff]   ;;  %v2100_v44 = vld [vmem:[#allocation2 + $0x68] sm:$0xff]   ;;  %vm1460_vm6 = vcmask 1040384   ;;  %vm1628_vm7 = vcmask 130112   ;;  %vm1631_vm8 = vcmask 122880  }
  0x52   : > { %s1822_s12 = sshll.u32 %s290_s9, 4  ;;  %v377_v3 = vsub.s32 1, %v2443_v2  ;;  %v2458_v4 = vsub.s32 0, %v2443_v2  ;;  %v388_v8 = vsub.s32 2, %v2443_v2  ;;  %v399_v9 = vsub.s32 3, %v2443_v2  ;;  %1826 = vmatprep.subr.bf16.mxu1 %v2090_v34  ;;  %v2097_v41 = vld [vmem:[#allocation2 + $0x18] sm:$0xff]  }
  0x53   : > { %s293_s10 = scalar_lea.vmem %s2734_s0, %s1822_s12  ;;  %s2454_s18 = scalar_lea.vmem %s2735_s1, %s1822_s12  ;;  %v410_v13 = vsub.s32 4, %v2443_v2  ;;  %v421_v14 = vsub.s32 5, %v2443_v2  ;;  %v432_v17 = vsub.s32 6, %v2443_v2  ;;  %v443_v18 = vsub.s32 7, %v2443_v2  ;;  %v2098_v42 = vld [vmem:[#allocation2 + $0x60] sm:$0xff]   ;;  %v2101_v45 = vld [vmem:[#allocation2 + $0x28] sm:$0xff]  }
  0x54   : > { %v300_v6 = vld [vmem:[%s293_s10] sm:$0xff]  ;;  %v301_v7 = vld [vmem:[%s293_s10 + $0x8] sm:$0xff]  ;;  %v2102_v46 = vld [vmem:[#allocation2 + $0x70] sm:$0xff]   ;;  %s287_s9 = sand.u32 1, %s2264_s22   ;;  %s1819_s12 = sshll.u32 %s2338_s25, 4 }
  0x55   : > { %v302_v11 = vpack.c.bf16 %v301_v7, %v300_v6  ;;  %v2466_v12 = vld [vmem:[%s2454_s18] sm:$0xff]  ;;  %v2482_v24 = vld [vmem:[%s2454_s18 + $0x8] sm:$0xff]  ;;  %v2103_v47 = vld [vmem:[#allocation2 + $0x30] sm:$0xff]   ;;  %s288_s14 = scalar_lea.vmem [#allocation7], %s287_s9  ;;  %s2692_s17 = scalar_lea.hbm %s2740_s6, %s1819_s12 }
  0x56   : > { %v378_v15 = vrot.slane %v2466_v12, %v377_v3  ;;  %v367_v16 = vrot.slane %v2466_v12, %v2458_v4  ;;  %v389_v19 = vrot.slane %v2466_v12, %v388_v8  ;;  %v400_v20 = vrot.slane %v2466_v12, %v399_v9  ;;  %v2099_v43 = vld [vmem:[#allocation2 + $0x20] sm:$0xff]   ;;  %v2104_v48 = vld [vmem:[#allocation2 + $0x78] sm:$0xff]   ;;  %s1646_s29 = sshll.u32 %s288_s14, 4  ;;  %s1634_s25 = scalar_lea.sflag [#allocation4], %s287_s9  ;;  %s2694_s29 = int_to_ptr.vmem [resolvable:$true] %s1646_s29 }
  0x57   : > { %1902 = vmatmul.mubr.msk.bf16.vlgmr.msra.gmra.mrb[0].mxu1 %vm309_vm2, %v302_v11  ;;  %v411_v21 = vrot.slane %v2466_v12, %v410_v13  ;;  %v422_v22 = vrot.slane %v2466_v12, %v421_v14  ;;  %v433_v23 = vrot.slane %v2466_v12, %v432_v17  ;;  %v444_v25 = vrot.slane %v2466_v12, %v443_v18  ;;  %v2105_v49 = vld [vmem:[#allocation2 + $0x38] sm:$0xff]   ;;  %v2498_v50 = vld [vmem:[%s2739_s5 + $0x3] ss:$0 sm:$0xff]  ;;  %v2503_v51 = vld [vmem:[%s2739_s5 + $0x4] ss:$0 sm:$0xff]  ;;  %s2202_s18 = scalar_lea.vmem %s2694_s29, 16 }
  0x58   : > { %380 = vbcast.lane.b32.xlu1 %v378_v15, 256  ;;  %369 = vbcast.lane.b32.xlu0 %v367_v16, 256  ;;  %v455_v26 = vrot.slane %v2482_v24, %v2458_v4  ;;  %v466_v27 = vrot.slane %v2482_v24, %v377_v3  ;;  %v477_v28 = vrot.slane %v2482_v24, %v388_v8  ;;  %vm852_vm3 = vcmp.gt.f32.partialorder %v2466_v12, 0.0  ;;  %v2107_v12 = vld [vmem:[#allocation5 + $0x8] sm:$0xff]   ;;  %p2203_p12 = scmp.ne.s32.totalorder %s2694_s29, %s2202_s18  ;;  %p2753_p1 = scmp.ne.s32.totalorder %s2744_s7, 0 }
  0x59   : > { %v488_v29 = vrot.slane %v2482_v24, %v399_v9  ;;  %v499_v30 = vrot.slane %v2482_v24, %v410_v13  ;;  %v510_v31 = vrot.slane %v2482_v24, %v421_v14  ;;  %v521_v32 = vrot.slane %v2482_v24, %v432_v17  ;;  %1827 = vmatpush3.bf16.msra.mxu1 %v2091_v35  ;;  %s2281_s19 = smov [#allocation7]  }
  0x5a   : > { %v532_v33 = vrot.slane %v2482_v24, %v443_v18  ;;  %1828 = vmatprep.subr.bf16.mxu1 %v2092_v36  ;;  %vm853_vm4 = vcmp.gt.f32.partialorder %v2482_v24, 0.0  ;;  %v2108_v24 = vld [vmem:[#allocation5 + $0x10] sm:$0xff]   ;;  %p2204_p2 = pnand %p2203_p12, %p2753_p1  ;;  %s2206_s20 = sshll.u32 %s2281_s19, 4  ;;  %s2207_s20 = int_to_ptr.vmem [resolvable:$false] %s2206_s20 }
  0x5b   : > { %s2208_s26 = scalar_lea.vmem %s2207_s20, 32  ;;  %p2209_p4 = scmp.lt.s32.totalorder %s2694_s29, %s2207_s20 }
  0x5c   : > { %384 = vbcast.lane.b32.xlu1 %v378_v15, 264  ;;  %373 = vbcast.lane.b32.xlu0 %v367_v16, 264  ;;  %p2205_p3 = pneg %p2204_p2  ;;  %p2210_p7 = scmp.lt.s32.totalorder %s2208_s26, %s2202_s18 }
  0x5d   : > { %1829 = vmatpush3.bf16.msra.mxu1 %v2093_v37 }
  0x5e   : > { %1830 = vmatprep.subr.bf16.mxu1 %v2094_v38  ;;  %p2211_p8 = por %p2210_p7, %p2209_p4 }
  0x60   : > { %395 = vbcast.lane.b32.xlu1 %v389_v19, 264  ;;  %391 = vbcast.lane.b32.xlu0 %v389_v19, 256  ;;  %p2212_p11 = pnand %p2211_p8, %p2205_p3 }
  0x61   : > { %1831 = vmatpush3.bf16.msra.mxu1 %v2095_v39 }
  0x62   : > { %1832 = vmatprep.subr.bf16.mxu1 %v2096_v40 }
  0x64   : > { %406 = vbcast.lane.b32.xlu1 %v400_v20, 264  ;;  %402 = vbcast.lane.b32.xlu0 %v400_v20, 256 }
  0x65   : > { %1833 = vmatpush3.bf16.msra.mxu1 %v2097_v41 }
  0x66   : > { %1834 = vmatprep.subr.bf16.mxu1 %v2098_v42 }
  0x68   : > { %417 = vbcast.lane.b32.xlu1 %v411_v21, 264  ;;  %413 = vbcast.lane.b32.xlu0 %v411_v21, 256 }
  0x69   : > { %1835 = vmatpush3.bf16.msra.mxu1 %v2099_v43 }
  0x6a   : > { %1836 = vmatprep.subr.bf16.mxu1 %v2100_v44 }
  0x6c   : > { %428 = vbcast.lane.b32.xlu1 %v422_v22, 264  ;;  %424 = vbcast.lane.b32.xlu0 %v422_v22, 256 }
  0x6d   : > { %1837 = vmatpush3.bf16.msra.mxu1 %v2101_v45 }
  0x6e   : > { %1838 = vmatprep.subr.bf16.mxu1 %v2102_v46 }
  0x70   : > { %439 = vbcast.lane.b32.xlu1 %v433_v23, 264  ;;  %435 = vbcast.lane.b32.xlu0 %v433_v23, 256 }
  0x71   : > { %1839 = vmatpush3.bf16.msra.mxu1 %v2103_v47 }
  0x72   : > { %1840 = vmatprep.subr.bf16.mxu1 %v2104_v48 }
  0x74   : > { %450 = vbcast.lane.b32.xlu1 %v444_v25, 264  ;;  %446 = vbcast.lane.b32.xlu0 %v444_v25, 256 }
  0x75   : > { %1841 = vmatpush3.bf16.msra.mxu1 %v2105_v49 }
  0x76   : > { %1931 = vmatprep.subr.bf16.mxu1 %v2278_v1 }
  0x78   : > { %461 = vbcast.lane.b32.xlu1 %v455_v26, 264  ;;  %457 = vbcast.lane.b32.xlu0 %v455_v26, 256 }
  0x7c   : > { %472 = vbcast.lane.b32.xlu1 %v466_v27, 264  ;;  %468 = vbcast.lane.b32.xlu0 %v466_v27, 256 }
  0x80   : > { %483 = vbcast.lane.b32.xlu1 %v477_v28, 264  ;;  %479 = vbcast.lane.b32.xlu0 %v477_v28, 256 }
  0x84   : > { %494 = vbcast.lane.b32.xlu1 %v488_v29, 264  ;;  %490 = vbcast.lane.b32.xlu0 %v488_v29, 256 }
  0x88   : > { %505 = vbcast.lane.b32.xlu1 %v499_v30, 264  ;;  %501 = vbcast.lane.b32.xlu0 %v499_v30, 256 }
  0x8c   : > { %516 = vbcast.lane.b32.xlu1 %v510_v31, 264  ;;  %512 = vbcast.lane.b32.xlu0 %v510_v31, 256 }
  0x90   : > { %527 = vbcast.lane.b32.xlu1 %v521_v32, 264  ;;  %523 = vbcast.lane.b32.xlu0 %v521_v32, 256 }
  0x94   : > { %538 = vbcast.lane.b32.xlu1 %v532_v33, 264  ;;  %534 = vbcast.lane.b32.xlu0 %v532_v33, 256 }
  0xca   : > { %v381_v52 = vpop.permute.xlu1 %380  ;;  %v370_v53 = vpop.permute.xlu0 %369 }
  0xcb   : > { %v546_v54 = vmul.f32 %v2498_v50, %v381_v52  ;;  %v544_v55 = vmul.f32 %v2498_v50, %v370_v53 }
  0xcd   : > { %v582_v56 = vadd.f32 %v2503_v51, %v546_v54  ;;  %v580_v57 = vadd.f32 %v2503_v51, %v544_v55 }
  0xce   : > { %v385_v58 = vpop.permute.xlu1 %384  ;;  %v374_v59 = vpop.permute.xlu0 %373 }
  0xcf   : > { %v547_v60 = vmul.f32 %v2498_v50, %v385_v58  ;;  %v545_v61 = vmul.f32 %v2498_v50, %v374_v59  ;;  %v614_v62 = vmax.f32 %v582_v56, 0.0  ;;  %v612_v63 = vmax.f32 %v580_v57, 0.0 }
  0xd1   : > { %v583_v3 = vadd.f32 %v2503_v51, %v547_v60  ;;  %v581_v5 = vadd.f32 %v2503_v51, %v545_v61  ;;  %v644_v13 = vadd.f32 %v614_v62, %v612_v63 }
  0xd2   : > { %v396_v6 = vpop.permute.xlu1 %395  ;;  %v392_v7 = vpop.permute.xlu0 %391 }
  0xd3   : > { %v615_v8 = vmax.f32 %v583_v3, 0.0  ;;  %v613_v9 = vmax.f32 %v581_v5, 0.0  ;;  %v549_v10 = vmul.f32 %v2498_v50, %v396_v6  ;;  %v548_v11 = vmul.f32 %v2498_v50, %v392_v7 }
  0xd5   : > { %v659_v14 = vadd.f32 %v615_v8, %v613_v9  ;;  %v585_v15 = vadd.f32 %v2503_v51, %v549_v10  ;;  %v584_v16 = vadd.f32 %v2503_v51, %v548_v11 }
  0xd6   : > { %v407_v17 = vpop.permute.xlu1 %406  ;;  %v403_v18 = vpop.permute.xlu0 %402 }
  0xd7   : > { %v617_v19 = vmax.f32 %v585_v15, 0.0  ;;  %v616_v20 = vmax.f32 %v584_v16, 0.0  ;;  %v551_v21 = vmul.f32 %v2498_v50, %v407_v17  ;;  %v550_v22 = vmul.f32 %v2498_v50, %v403_v18 }
  0xd9   : > { %v660_v23 = vadd.f32 %v659_v14, %v617_v19  ;;  %v645_v25 = vadd.f32 %v644_v13, %v616_v20  ;;  %v587_v26 = vadd.f32 %v2503_v51, %v551_v21  ;;  %v586_v27 = vadd.f32 %v2503_v51, %v550_v22 }
  0xda   : > { %v418_v28 = vpop.permute.xlu1 %417  ;;  %v414_v29 = vpop.permute.xlu0 %413 }
  0xdb   : > { %v619_v30 = vmax.f32 %v587_v26, 0.0  ;;  %v618_v31 = vmax.f32 %v586_v27, 0.0  ;;  %v553_v32 = vmul.f32 %v2498_v50, %v418_v28  ;;  %v552_v33 = vmul.f32 %v2498_v50, %v414_v29 }
  0xdd   : > { %v661_v34 = vadd.f32 %v660_v23, %v619_v30  ;;  %v646_v35 = vadd.f32 %v645_v25, %v618_v31  ;;  %v589_v36 = vadd.f32 %v2503_v51, %v553_v32  ;;  %v588_v37 = vadd.f32 %v2503_v51, %v552_v33 }
  0xde   : > { %v429_v38 = vpop.permute.xlu1 %428  ;;  %v425_v39 = vpop.permute.xlu0 %424 }
  0xdf   : > { %v621_v40 = vmax.f32 %v589_v36, 0.0  ;;  %v620_v41 = vmax.f32 %v588_v37, 0.0  ;;  %v555_v42 = vmul.f32 %v2498_v50, %v429_v38  ;;  %v554_v43 = vmul.f32 %v2498_v50, %v425_v39 }
  0xe1   : > { %v662_v44 = vadd.f32 %v661_v34, %v621_v40  ;;  %v647_v45 = vadd.f32 %v646_v35, %v620_v41  ;;  %v591_v46 = vadd.f32 %v2503_v51, %v555_v42  ;;  %v590_v47 = vadd.f32 %v2503_v51, %v554_v43 }
  0xe2   : > { %v440_v48 = vpop.permute.xlu1 %439  ;;  %v436_v49 = vpop.permute.xlu0 %435 }
  0xe3   : > { %v623_v52 = vmax.f32 %v591_v46, 0.0  ;;  %v622_v53 = vmax.f32 %v590_v47, 0.0  ;;  %v557_v54 = vmul.f32 %v2498_v50, %v440_v48  ;;  %v556_v55 = vmul.f32 %v2498_v50, %v436_v49 }
  0xe5   : > { %v663_v56 = vadd.f32 %v662_v44, %v623_v52  ;;  %v648_v57 = vadd.f32 %v647_v45, %v622_v53  ;;  %v593_v58 = vadd.f32 %v2503_v51, %v557_v54  ;;  %v592_v59 = vadd.f32 %v2503_v51, %v556_v55 }
  0xe6   : > { %v451_v60 = vpop.permute.xlu1 %450  ;;  %v447_v61 = vpop.permute.xlu0 %446 }
  0xe7   : > { %v625_v62 = vmax.f32 %v593_v58, 0.0  ;;  %v624_v63 = vmax.f32 %v592_v59, 0.0  ;;  %v559_v3 = vmul.f32 %v2498_v50, %v451_v60  ;;  %v558_v5 = vmul.f32 %v2498_v50, %v447_v61 }
  0xe9   : > { %v664_v6 = vadd.f32 %v663_v56, %v625_v62  ;;  %v649_v7 = vadd.f32 %v648_v57, %v624_v63  ;;  %v595_v8 = vadd.f32 %v2503_v51, %v559_v3  ;;  %v594_v9 = vadd.f32 %v2503_v51, %v558_v5 }
  0xea   : > { %v462_v10 = vpop.permute.xlu1 %461  ;;  %v458_v11 = vpop.permute.xlu0 %457 }
  0xeb   : > { %v627_v13 = vmax.f32 %v595_v8, 0.0  ;;  %v626_v14 = vmax.f32 %v594_v9, 0.0  ;;  %v561_v15 = vmul.f32 %v2498_v50, %v462_v10  ;;  %v560_v16 = vmul.f32 %v2498_v50, %v458_v11 }
  0xed   : > { %v665_v17 = vadd.f32 %v664_v6, %v627_v13  ;;  %v650_v18 = vadd.f32 %v649_v7, %v626_v14  ;;  %v597_v19 = vadd.f32 %v2503_v51, %v561_v15  ;;  %v596_v20 = vadd.f32 %v2503_v51, %v560_v16 }
  0xee   : > { %v473_v21 = vpop.permute.xlu1 %472  ;;  %v469_v22 = vpop.permute.xlu0 %468 }
  0xef   : > { %v629_v23 = vmax.f32 %v597_v19, 0.0  ;;  %v628_v25 = vmax.f32 %v596_v20, 0.0  ;;  %v563_v26 = vmul.f32 %v2498_v50, %v473_v21  ;;  %v562_v27 = vmul.f32 %v2498_v50, %v469_v22 }
  0xf1   : > { %v666_v28 = vadd.f32 %v665_v17, %v629_v23  ;;  %v651_v29 = vadd.f32 %v650_v18, %v628_v25  ;;  %v599_v30 = vadd.f32 %v2503_v51, %v563_v26  ;;  %v598_v31 = vadd.f32 %v2503_v51, %v562_v27 }
  0xf2   : > { %v484_v32 = vpop.permute.xlu1 %483  ;;  %v480_v33 = vpop.permute.xlu0 %479 }
  0xf3   : > { %v631_v34 = vmax.f32 %v599_v30, 0.0  ;;  %v630_v35 = vmax.f32 %v598_v31, 0.0  ;;  %v565_v36 = vmul.f32 %v2498_v50, %v484_v32  ;;  %v564_v37 = vmul.f32 %v2498_v50, %v480_v33 }
  0xf5   : > { %v667_v38 = vadd.f32 %v666_v28, %v631_v34  ;;  %v652_v39 = vadd.f32 %v651_v29, %v630_v35  ;;  %v601_v40 = vadd.f32 %v2503_v51, %v565_v36  ;;  %v600_v41 = vadd.f32 %v2503_v51, %v564_v37 }
  0xf6   : > { %v495_v42 = vpop.permute.xlu1 %494  ;;  %v491_v43 = vpop.permute.xlu0 %490 }
  0xf7   : > { %v633_v44 = vmax.f32 %v601_v40, 0.0  ;;  %v632_v45 = vmax.f32 %v600_v41, 0.0  ;;  %v567_v46 = vmul.f32 %v2498_v50, %v495_v42  ;;  %v566_v47 = vmul.f32 %v2498_v50, %v491_v43  ;;  %v1747_v41 = vld [vmem:[%s2739_s5] ss:$0 sm:$0xff] }
  0xf9   : > { %v668_v48 = vadd.f32 %v667_v38, %v633_v44  ;;  %v653_v49 = vadd.f32 %v652_v39, %v632_v45  ;;  %v603_v52 = vadd.f32 %v2503_v51, %v567_v46  ;;  %v602_v53 = vadd.f32 %v2503_v51, %v566_v47 }
  0xfa   : > { %v506_v54 = vpop.permute.xlu1 %505  ;;  %v502_v55 = vpop.permute.xlu0 %501 }
  0xfb   : > { %v635_v56 = vmax.f32 %v603_v52, 0.0  ;;  %v634_v57 = vmax.f32 %v602_v53, 0.0  ;;  %v569_v58 = vmul.f32 %v2498_v50, %v506_v54  ;;  %v568_v59 = vmul.f32 %v2498_v50, %v502_v55  ;;  %v1751_v52 = vld [vmem:[%s2739_s5 + $0x1] ss:$0 sm:$0xff] }
  0xfd   : > { %v669_v60 = vadd.f32 %v668_v48, %v635_v56  ;;  %v654_v61 = vadd.f32 %v653_v49, %v634_v57  ;;  %v605_v62 = vadd.f32 %v2503_v51, %v569_v58  ;;  %v604_v63 = vadd.f32 %v2503_v51, %v568_v59  ;;  %v2580_v57 = vld [vmem:[%s2739_s5 + $0x2] ss:$0 sm:$0xff] }
  0xfe   : > { %v517_v3 = vpop.permute.xlu1 %516  ;;  %v513_v5 = vpop.permute.xlu0 %512 }
  0xff   : > { %v637_v6 = vmax.f32 %v605_v62, 0.0  ;;  %v636_v7 = vmax.f32 %v604_v63, 0.0  ;;  %v571_v8 = vmul.f32 %v2498_v50, %v517_v3  ;;  %v570_v9 = vmul.f32 %v2498_v50, %v513_v5 }
 0x100   : > { %v1768_v5 = vsel %vm852_vm3, 1.0, %v2278_v1 }
 0x101   : > { %v670_v10 = vadd.f32 %v669_v60, %v637_v6  ;;  %v655_v11 = vadd.f32 %v654_v61, %v636_v7  ;;  %v607_v13 = vadd.f32 %v2503_v51, %v571_v8  ;;  %v606_v14 = vadd.f32 %v2503_v51, %v570_v9  ;;  %v2106_v9 = vld [vmem:[#allocation5] sm:$0xff]  }
 0x102   : > { %v528_v15 = vpop.permute.xlu1 %527  ;;  %v524_v16 = vpop.permute.xlu0 %523  ;;  %v1769_v6 = vsel %vm853_vm4, 1.0, %v2278_v1 }
 0x103   : > { %v639_v17 = vmax.f32 %v607_v13, 0.0  ;;  %v638_v18 = vmax.f32 %v606_v14, 0.0  ;;  %v573_v19 = vmul.f32 %v2498_v50, %v528_v15  ;;  %v572_v20 = vmul.f32 %v2498_v50, %v524_v16  ;;  %v2111_v13 = vld [vmem:[#allocation5 + $0x28] sm:$0xff]   ;;  %v2112_v14 = vld [vmem:[#allocation5 + $0x30] sm:$0xff]   ;;  %v2113_v15 = vld [vmem:[#allocation5 + $0x38] sm:$0xff]  }
 0x104   : > { %v2594_v8 = vpack.c.bf16 %v1769_v6, %v1768_v5  ;;  %v2127_v5 = vld [vmem:[#allocation5 + $0x28] sm:$0xff]   ;;  %v2128_v6 = vld [vmem:[#allocation5 + $0x30] sm:$0xff]  }
 0x105   : > { %v671_v21 = vadd.f32 %v670_v10, %v639_v17  ;;  %v656_v22 = vadd.f32 %v655_v11, %v638_v18  ;;  %v609_v23 = vadd.f32 %v2503_v51, %v573_v19  ;;  %v608_v25 = vadd.f32 %v2503_v51, %v572_v20  ;;  %v2109_v10 = vld [vmem:[#allocation5 + $0x18] sm:$0xff]   ;;  %v2110_v11 = vld [vmem:[#allocation5 + $0x20] sm:$0xff]  }
 0x106   : > { %v539_v26 = vpop.permute.xlu1 %538  ;;  %v535_v27 = vpop.permute.xlu0 %534 }
 0x107   : > { %v641_v28 = vmax.f32 %v609_v23, 0.0  ;;  %v640_v29 = vmax.f32 %v608_v25, 0.0  ;;  %v575_v30 = vmul.f32 %v2498_v50, %v539_v26  ;;  %v574_v31 = vmul.f32 %v2498_v50, %v535_v27 }
 0x109   : > { %v672_v32 = vadd.f32 %v671_v21, %v641_v28  ;;  %v657_v33 = vadd.f32 %v656_v22, %v640_v29  ;;  %v611_v34 = vadd.f32 %v2503_v51, %v575_v30  ;;  %v610_v35 = vadd.f32 %v2503_v51, %v574_v31 }
 0x10b   : > { %v643_v36 = vmax.f32 %v611_v34, 0.0  ;;  %v642_v37 = vmax.f32 %v610_v35, 0.0  ;;  %v2115_v34 = vld [vmem:[#allocation5 + $0x8] sm:$0xff]   ;;  %v2116_v35 = vld [vmem:[#allocation5 + $0x10] sm:$0xff]  }
 0x10d   : > { %v673_v38 = vadd.f32 %v672_v32, %v643_v36  ;;  %v658_v39 = vadd.f32 %v657_v33, %v642_v37  ;;  %v2114_v33 = vld [vmem:[#allocation5] sm:$0xff]   ;;  %v2117_v36 = vld [vmem:[#allocation5 + $0x18] sm:$0xff]  }
 0x10e   : > { %v2118_v37 = vld [vmem:[#allocation5 + $0x20] sm:$0xff]  }
 0x10f   : > { %v677_v40 = vpack.c.bf16 %v673_v38, %v658_v39  ;;  %v2119_v38 = vld [vmem:[#allocation5 + $0x28] sm:$0xff]   ;;  %v2120_v39 = vld [vmem:[#allocation5 + $0x30] sm:$0xff]  }
 0x111   : > { %843 = vmatprep.mubr.bf16.mxu1 %v677_v40  ;;  %v2121_v40 = vld [vmem:[#allocation5 + $0x38] sm:$0xff]  }
 0x12a   : > { %v351_v42 = vpop.f32.mrb[0].mxu1 }
 0x12b   : > { %v352_v43 = vadd.f32 %v1747_v41, %v351_v42  ;;  %v1903_v44 = vpop.f32.mrb[1].mxu1 }
 0x12c   : > { %v354_v50 = vpop.f32.mrb[2].mxu1 }
 0x12d   : > { %v355_v45 = vadd.f32 %v1747_v41, %v354_v50  ;;  %v1904_v46 = vpop.f32.mrb[3].mxu1  ;;  %v358_v47 = vmax.f32 %v352_v43, 0.0 }
 0x12f   : > { %v359_v48 = vmax.f32 %v355_v45, 0.0 }
 0x131   : > { %v676_v49 = vpack.c.bf16 %v359_v48, %v358_v47 }
 0x133   : > { %844 = vmatmul.mubr.bf16.vlgmr.msra.gmra.mrb[4].mxu1 %v676_v49 }
 0x134   : > { %1933 = vmatprep.mubr.msk.bf16.mxu1 %vm2279_vm0, %v2278_v1 }
 0x206   : > { %v1842_v51 = vpop.f32.mrb[4].mxu1 }
 0x207   : > { %v1843_v53 = vpop.f32.mrb[5].mxu1 }
 0x208   : > { %v1844_v54 = vadd.f32 %v1843_v53, %v1842_v51  ;;  %v1845_v55 = vpop.f32.mrb[6].mxu1 }
 0x209   : > { %v1846_v56 = vpop.f32.mrb[7].mxu1 }
 0x20a   : > { %v2582_v58 = vadd.f32 %v1844_v54, %v1751_v52  ;;  %v1847_v59 = vadd.f32 %v1846_v56, %v1845_v55 }
 0x20c   : > { %v2584_v60 = vadd.f32 %v1847_v59, %v1751_v52  ;;  %v864_v61 = vadd.f32 %v2580_v57, %v2582_v58  ;;  %v2122_v59 = vld [vmem:[#allocation5] sm:$0xff]  }
 0x20e   : > { %v865_v62 = vadd.f32 %v2580_v57, %v2584_v60  ;;  %v866_v63 = vmax.f32 %v864_v61, 0.0  ;;  %v2123_v61 = vld [vmem:[#allocation5 + $0x8] sm:$0xff]  }
 0x210   : > { %v867_v3 = vmax.f32 %v865_v62, 0.0  ;;  %v2124_v62 = vld [vmem:[#allocation5 + $0x10] sm:$0xff]  }
 0x212   : > { %v868_v7 = vpack.c.bf16 %v867_v3, %v866_v63  ;;  %v2125_v63 = vld [vmem:[#allocation5 + $0x18] sm:$0xff]   ;;  %v2126_v3 = vld [vmem:[#allocation5 + $0x20] sm:$0xff]  }
 0x214   : > { %1906 = vmatpush3.bf16.msra.mxu0 %v868_v7  ;;  %v2129_v7 = vld [vmem:[#allocation5 + $0x38] sm:$0xff]  }
 0x215   : > { %1911 = vmatprep.subr.bf16.mxu0 %v2278_v1 }
 0x217   : > { %1908 = vmatmul.mubr.msk.bf16.vlgmr.msra.gmra.mrb[0].mxu0 %vm869_vm5, %v2594_v8 }
 0x218   : > { %1912 = vmatpush3.bf16.msra.mxu0 %v2106_v9  ;;  %1927 = vmatprep.mubr.msk.bf16.mxu0 %vm2279_vm0, %v2278_v1  ;;  %v2136_v9 = vld [vmem:[#allocation5 + $0x48] sm:$0xff]  }
 0x219   : > { %1913 = vmatprep.subr.bf16.mxu0 %v2278_v1 }
 0x21c   : > { %1914 = vmatpush3.bf16.msra.mxu0 %v2107_v12 }
 0x21d   : > { %1915 = vmatprep.subr.bf16.mxu0 %v2278_v1 }
 0x220   : > { %1916 = vmatpush3.bf16.msra.mxu0 %v2108_v24 }
 0x221   : > { %1917 = vmatprep.subr.bf16.mxu0 %v2278_v1 }
 0x224   : > { %1918 = vmatpush3.bf16.msra.mxu0 %v2109_v10 }
 0x225   : > { %1919 = vmatprep.subr.bf16.mxu0 %v2278_v1 }
 0x228   : > { %1920 = vmatpush3.bf16.msra.mxu0 %v2110_v11  ;;  %v2130_v11 = vld [vmem:[#allocation5 + $0x80] sm:$0xff]  }
 0x229   : > { %1921 = vmatprep.subr.bf16.mxu0 %v2278_v1 }
 0x22c   : > { %1922 = vmatpush3.bf16.msra.mxu0 %v2111_v13 }
 0x22d   : > { %1923 = vmatprep.subr.bf16.mxu0 %v2278_v1 }
 0x230   : > { %1924 = vmatpush3.bf16.msra.mxu0 %v2112_v14 }
 0x231   : > { %1925 = vmatprep.subr.bf16.mxu0 %v2278_v1 }
 0x234   : > { %1926 = vmatpush3.bf16.msra.mxu0 %v2113_v15  ;;  %v2131_v15 = vld [vmem:[#allocation5 + $0x88] sm:$0xff]  }
 0x235   : > { %1957 = vmatprep.subr.bf16.mxu0 %v2278_v1 }
 0x2ea   : > { %v907_v16 = vpop.f32.mrb[0].mxu0 }
 0x2eb   : > { %v1909_v17 = vpop.f32.mrb[1].mxu0 }
 0x2ec   : > { %v910_v18 = vpop.f32.mrb[2].mxu0  ;;  %v2133_v17 = vld [vmem:[#allocation5 + $0x98] sm:$0xff]  }
 0x2ed   : > { %v914_v19 = vpack.c.bf16 %v910_v18, %v907_v16  ;;  %v1910_v20 = vpop.f32.mrb[3].mxu0  ;;  %v2132_v16 = vld [vmem:[#allocation5 + $0x90] sm:$0xff]   ;;  %v2135_v18 = vld [vmem:[#allocation5 + $0xa0] sm:$0xff]  }
 0x2ee   : > { %v2138_v20 = vld [vmem:[#allocation5 + $0x50] sm:$0xff]  }
 0x2ef   : > { %1928 = vmatmul.mubr.bf16.vlgmr.msra.gmra.mrb[4].mxu0 %v914_v19  ;;  %v2137_v19 = vld [vmem:[#allocation5 + $0xa8] sm:$0xff]  }
 0x2f0   : > { %1959 = vmatprep.mubr.msk.bf16.mxu0 %vm2279_vm0, %v2278_v1 }
 0x3c2   : > { %v1018_v21 = vpop.f32.mrb[4].mxu0 }
 0x3c3   : > { %v1019_v22 = vadd.f32 %v2580_v57, %v1018_v21  ;;  %v1929_v23 = vpop.f32.mrb[5].mxu0  ;;  %v2139_v21 = vld [vmem:[#allocation5 + $0xb0] sm:$0xff]  }
 0x3c4   : > { %v1021_v25 = vpop.f32.mrb[6].mxu0  ;;  %v2141_v23 = vld [vmem:[#allocation5 + $0xb8] sm:$0xff]  }
 0x3c5   : > { %v1025_v26 = vadd.f32 %v1019_v22, %v2582_v58  ;;  %v1022_v27 = vadd.f32 %v2580_v57, %v1021_v25  ;;  %v1930_v28 = vpop.f32.mrb[7].mxu0  ;;  %v2140_v22 = vld [vmem:[#allocation5 + $0x58] sm:$0xff]   ;;  %v2142_v25 = vld [vmem:[#allocation5 + $0x60] sm:$0xff]  }
 0x3c6   : > { %v2145_v28 = vld [vmem:[#allocation5 + $0x78] sm:$0xff]  }
 0x3c7   : > { %v1026_v29 = vadd.f32 %v1022_v27, %v2584_v60  ;;  %v1027_v30 = vmax.f32 %v1025_v26, 0.0  ;;  %v2143_v26 = vld [vmem:[#allocation5 + $0x68] sm:$0xff]   ;;  %v2144_v27 = vld [vmem:[#allocation5 + $0x70] sm:$0xff]  }
 0x3c9   : > { %v1028_v31 = vmax.f32 %v1026_v29, 0.0 }
 0x3cb   : > { %v1029_v32 = vpack.c.bf16 %v1028_v31, %v1027_v30 }
 0x3cd   : > { %1932 = vmatpush3.bf16.msra.mxu1 %v1029_v32 }
 0x3ce   : > { %1937 = vmatprep.subr.bf16.mxu1 %v2278_v1 }
 0x3d0   : > { %1934 = vmatmul.mubr.msk.bf16.vlgmr.msra.gmra.mrb[8].mxu1 %vm869_vm5, %v2594_v8 }
 0x3d1   : > { %1938 = vmatpush3.bf16.msra.mxu1 %v2114_v33  ;;  %1953 = vmatprep.mubr.msk.bf16.mxu1 %vm2279_vm0, %v2278_v1 }
 0x3d2   : > { %1939 = vmatprep.subr.bf16.mxu1 %v2278_v1 }
 0x3d5   : > { %1940 = vmatpush3.bf16.msra.mxu1 %v2115_v34 }
 0x3d6   : > { %1941 = vmatprep.subr.bf16.mxu1 %v2278_v1 }
 0x3d9   : > { %1942 = vmatpush3.bf16.msra.mxu1 %v2116_v35 }
 0x3da   : > { %1943 = vmatprep.subr.bf16.mxu1 %v2278_v1 }
 0x3dd   : > { %1944 = vmatpush3.bf16.msra.mxu1 %v2117_v36 }
 0x3de   : > { %1945 = vmatprep.subr.bf16.mxu1 %v2278_v1 }
 0x3e1   : > { %1946 = vmatpush3.bf16.msra.mxu1 %v2118_v37 }
 0x3e2   : > { %1947 = vmatprep.subr.bf16.mxu1 %v2278_v1 }
 0x3e5   : > { %1948 = vmatpush3.bf16.msra.mxu1 %v2119_v38 }
 0x3e6   : > { %1949 = vmatprep.subr.bf16.mxu1 %v2278_v1 }
 0x3e9   : > { %1950 = vmatpush3.bf16.msra.mxu1 %v2120_v39 }
 0x3ea   : > { %1951 = vmatprep.subr.bf16.mxu1 %v2278_v1 }
 0x3ed   : > { %1952 = vmatpush3.bf16.msra.mxu1 %v2121_v40 }
 0x3ee   : > { %1983 = vmatprep.subr.bf16.mxu1 %v2278_v1 }
 0x4a3   : > { %v1064_v41 = vpop.f32.mrb[8].mxu1 }
 0x4a4   : > { %v1935_v42 = vpop.f32.mrb[9].mxu1 }
 0x4a5   : > { %v1067_v43 = vpop.f32.mrb[10].mxu1 }
 0x4a6   : > { %v1071_v44 = vpack.c.bf16 %v1067_v43, %v1064_v41  ;;  %v1936_v50 = vpop.f32.mrb[11].mxu1 }
 0x4a8   : > { %1954 = vmatmul.mubr.bf16.vlgmr.msra.gmra.mrb[12].mxu1 %v1071_v44 }
 0x4a9   : > { %1999 = vmatprep.mubr.msk.bf16.mxu1 %vm2279_vm0, %v2278_v1 }
 0x57b   : > { %v1175_v45 = vpop.f32.mrb[12].mxu1 }
 0x57c   : > { %v1176_v46 = vadd.f32 %v2580_v57, %v1175_v45  ;;  %v1955_v47 = vpop.f32.mrb[13].mxu1 }
 0x57d   : > { %v1178_v48 = vpop.f32.mrb[14].mxu1 }
 0x57e   : > { %v1182_v49 = vadd.f32 %v1176_v46, %v2582_v58  ;;  %v1179_v51 = vadd.f32 %v2580_v57, %v1178_v48  ;;  %v1956_v52 = vpop.f32.mrb[15].mxu1  ;;  %v2280_v46 = vmov 0  }
 0x57f   : > { %2088 = vset.pattern.permute.xlu0 %v2280_v46  ;;  %2089 = vset.pattern.permute.xlu1 %v2280_v46 }
 0x580   : > { %v1183_v53 = vadd.f32 %v1179_v51, %v2584_v60  ;;  %v1184_v54 = vmax.f32 %v1182_v49, 0.0  ;;  %v1818_v49 = vld [vmem:[%s2739_s5 + $0x8] ss:$0 sm:$0xff] }
 0x582   : > { %v1185_v55 = vmax.f32 %v1183_v53, 0.0 }
 0x584   : > { %v1186_v56 = vpack.c.bf16 %v1185_v55, %v1184_v54 }
 0x586   : > { %1958 = vmatpush3.bf16.msra.mxu0 %v1186_v56 }
 0x587   : > { %1963 = vmatprep.subr.bf16.mxu0 %v2278_v1 }
 0x589   : > { %1960 = vmatmul.mubr.msk.bf16.vlgmr.msra.gmra.mrb[8].mxu0 %vm869_vm5, %v2594_v8  ;;  %v2134_v8 = vld [vmem:[#allocation5 + $0x40] sm:$0xff]  }
 0x58a   : > { %1964 = vmatpush3.bf16.msra.mxu0 %v2122_v59  ;;  %1979 = vmatprep.mubr.msk.bf16.mxu0 %vm2279_vm0, %v2278_v1  ;;  %v1368_v59 = vld [vmem:[%s2739_s5 + $0x5] sm:$0x1] }
 0x58b   : > { %1965 = vmatprep.subr.bf16.mxu0 %v2278_v1  ;;  %1984 = vmatpush3.bf16.msra.mxu1 %v2134_v8 }
 0x58c   : > { %1985 = vmatprep.subr.bf16.mxu1 %v2278_v1 }
 0x58e   : > { %1966 = vmatpush3.bf16.msra.mxu0 %v2123_v61 }
 0x58f   : > { %1967 = vmatprep.subr.bf16.mxu0 %v2278_v1  ;;  %1986 = vmatpush3.bf16.msra.mxu1 %v2136_v9 }
 0x590   : > { %1987 = vmatprep.subr.bf16.mxu1 %v2278_v1 }
 0x592   : > { %1968 = vmatpush3.bf16.msra.mxu0 %v2124_v62 }
 0x593   : > { %1969 = vmatprep.subr.bf16.mxu0 %v2278_v1  ;;  %1988 = vmatpush3.bf16.msra.mxu1 %v2138_v20  ;;  %v1618_v20 = vand.u32 127, %v364_v0 }
 0x594   : > { %1989 = vmatprep.subr.bf16.mxu1 %v2278_v1 }
 0x596   : > { %1970 = vmatpush3.bf16.msra.mxu0 %v2125_v63 }
 0x597   : > { %1971 = vmatprep.subr.bf16.mxu0 %v2278_v1  ;;  %1990 = vmatpush3.bf16.msra.mxu1 %v2140_v22 }
 0x598   : > { %1991 = vmatprep.subr.bf16.mxu1 %v2278_v1 }
 0x59a   : > { %1972 = vmatpush3.bf16.msra.mxu0 %v2126_v3 }
 0x59b   : > { %1973 = vmatprep.subr.bf16.mxu0 %v2278_v1  ;;  %1992 = vmatpush3.bf16.msra.mxu1 %v2142_v25 }
 0x59c   : > { %1993 = vmatprep.subr.bf16.mxu1 %v2278_v1 }
 0x59e   : > { %1974 = vmatpush3.bf16.msra.mxu0 %v2127_v5  ;;  %v1458_v5 = vld [vmem:[%s2739_s5 + $0x7] sm:$0x1] }
 0x59f   : > { %1975 = vmatprep.subr.bf16.mxu0 %v2278_v1  ;;  %1994 = vmatpush3.bf16.msra.mxu1 %v2143_v26 }
 0x5a0   : > { %1995 = vmatprep.subr.bf16.mxu1 %v2278_v1 }
 0x5a2   : > { %1976 = vmatpush3.bf16.msra.mxu0 %v2128_v6 }
 0x5a3   : > { %1977 = vmatprep.subr.bf16.mxu0 %v2278_v1  ;;  %1996 = vmatpush3.bf16.msra.mxu1 %v2144_v27 }
 0x5a4   : > { %1997 = vmatprep.subr.bf16.mxu1 %v2278_v1 }
 0x5a6   : > { %1978 = vmatpush3.bf16.msra.mxu0 %v2129_v7 }
 0x5a7   : > { %2003 = vmatprep.subr.bf16.mxu0 %v2278_v1  ;;  %1998 = vmatpush3.bf16.msra.mxu1 %v2145_v28 }
 0x65c   : > { %v1221_v12 = vpop.f32.mrb[8].mxu0 }
 0x65d   : > { %v1961_v24 = vpop.f32.mrb[9].mxu0 }
 0x65e   : > { %v1224_v10 = vpop.f32.mrb[10].mxu0 }
 0x65f   : > { %v1228_v13 = vpack.c.bf16 %v1224_v10, %v1221_v12  ;;  %v1962_v14 = vpop.f32.mrb[11].mxu0  ;;  %v1597_v12 = vld [vmem:[%s2739_s5 + $0x9] sm:$0x1] }
 0x661   : > { %1980 = vmatmul.mubr.bf16.vlgmr.msra.gmra.mrb[12].mxu0 %v1228_v13 }
 0x662   : > { %2004 = vmatpush3.bf16.msra.mxu0 %v2130_v11  ;;  %2019 = vmatprep.mubr.msk.bf16.mxu0 %vm2279_vm0, %v2278_v1 }
 0x663   : > { %2005 = vmatprep.subr.bf16.mxu0 %v2278_v1 }
 0x666   : > { %2006 = vmatpush3.bf16.msra.mxu0 %v2131_v15 }
 0x667   : > { %2007 = vmatprep.subr.bf16.mxu0 %v2278_v1 }
 0x66a   : > { %2008 = vmatpush3.bf16.msra.mxu0 %v2132_v16 }
 0x66b   : > { %2009 = vmatprep.subr.bf16.mxu0 %v2278_v1 }
 0x66e   : > { %2010 = vmatpush3.bf16.msra.mxu0 %v2133_v17 }
 0x66f   : > { %2011 = vmatprep.subr.bf16.mxu0 %v2278_v1 }
 0x672   : > { %2012 = vmatpush3.bf16.msra.mxu0 %v2135_v18 }
 0x673   : > { %2013 = vmatprep.subr.bf16.mxu0 %v2278_v1 }
 0x676   : > { %2014 = vmatpush3.bf16.msra.mxu0 %v2137_v19 }
 0x677   : > { %2015 = vmatprep.subr.bf16.mxu0 %v2278_v1 }
 0x67a   : > { %2016 = vmatpush3.bf16.msra.mxu0 %v2139_v21  ;;  %v1623_v21 = vadd.s32 4294967288, %v1618_v20 }
 0x67b   : > { %2017 = vmatprep.subr.bf16.mxu0 %v2278_v1 }
 0x67c   : > { %v1626_v25 = vsub.s32 %v1623_v21, %v2443_v2 }
 0x67e   : > { %2018 = vmatpush3.bf16.msra.mxu0 %v2141_v23  ;;  %v1621_v23 = vsub.s32 %v1618_v20, %v2443_v2 }
 0x734   : > { %v1332_v29 = vpop.f32.mrb[12].mxu0 }
 0x735   : > { %v1333_v30 = vadd.f32 %v2580_v57, %v1332_v29  ;;  %v1981_v31 = vpop.f32.mrb[13].mxu0 }
 0x736   : > { %v1335_v32 = vpop.f32.mrb[14].mxu0 }
 0x737   : > { %v1339_v33 = vadd.f32 %v1333_v30, %v2582_v58  ;;  %v1336_v34 = vadd.f32 %v2580_v57, %v1335_v32  ;;  %v1982_v35 = vpop.f32.mrb[15].mxu0  ;;  %v1809_v57 = vld [vmem:[%s2739_s5 + $0x6] ss:$0 sm:$0xff] }
 0x739   : > { %v1340_v36 = vadd.f32 %v1336_v34, %v2584_v60  ;;  %v1341_v37 = vmax.f32 %v1339_v33, 0.0 }
 0x73b   : > { %v1342_v38 = vmax.f32 %v1340_v36, 0.0 }
 0x73d   : > { %v1343_v39 = vadd.f32 %v1342_v38, %v1341_v37  ;;  %v1464_v40 = vpack.c.bf16 %v1342_v38, %v1341_v37 }
 0x73f   : > { %v1344_v41 = vrot.slane %v1343_v39, 4  ;;  %2020 = vmatmul.mubr.bf16.vlgmr.msra.gmra.mrb[16].mxu0 %v1464_v40 }
 0x741   : > { %v1345_v1 = vadd.f32 %v1344_v41, %v1343_v39 }
 0x743   : > { %v1346_v42 = vrot.slane %v1345_v1, 2 }
 0x745   : > { %v1347_v43 = vadd.f32 %v1346_v42, %v1345_v1 }
 0x747   : > { %v1348_v44 = vrot.slane %v1347_v43, 1 }
 0x749   : > { %v1349_v50 = vadd.f32 %v1348_v44, %v1347_v43 }
 0x74b   : > { %v1350_v45 = vpack.c.bf16 %v1349_v50, %v1349_v50 }
 0x74d   : > { %2000 = vmatmul.mubr.bf16.vlgmr.msra.gmra.mrb[16].mxu1 %v1350_v45 }
 0x812   : > { %v1569_v58 = vpop.f32.mrb[16].mxu0 }
 0x813   : > { %v1570_v60 = vadd.f32 %v1809_v57, %v1569_v58  ;;  %v2021_v47 = vpop.f32.mrb[17].mxu0 }
 0x814   : > { %v1572_v48 = vpop.f32.mrb[18].mxu0 }
 0x815   : > { %v1576_v51 = vmax.f32 %v1570_v60, 0.0  ;;  %v1573_v52 = vadd.f32 %v1809_v57, %v1572_v48  ;;  %v2022_v53 = vpop.f32.mrb[19].mxu0 }
 0x817   : > { %v1577_v54 = vmax.f32 %v1573_v52, 0.0  ;;  %v1583_v55 = vmul.f32 %v1818_v49, %v1576_v51 }
 0x819   : > { %1585 = vadd.xlane.f32.xlu1 %v1583_v55  ;;  %v1584_v56 = vmul.f32 %v1818_v49, %v1577_v54 }
 0x81b   : > { %1587 = vadd.xlane.f32.xlu0 %v1584_v56 }
 0x820   : > { %v1451_v61 = vpop.f32.mrb[16].mxu1 }
 0x821   : > { %v1452_v62 = vadd.f32 %v1451_v61, %v1368_v59  ;;  %v2001_v63 = vpop.f32.mrb[17].mxu1 }
 0x822   : > { %v1454_v3 = vpop.f32.mrb[18].mxu1 }
 0x823   : > { %v1457_v6 = vmax.f32 %v1452_v62, 0.0  ;;  %v2002_v7 = vpop.f32.mrb[19].mxu1 }
 0x825   : > { %v1459_v8 = vmul.f32 %v1458_v5, %v1457_v6 }
 0x827   : > { %v1461_v9 = vsel %vm1460_vm6, %v1459_v8, 0.0 }
 0x828   : > { %1462 = vadd.xlane.f32.xlu0 %v1461_v9 }
 0x83e   : > { %1600 = vperm.xlu0 %2088, %v1597_v12  }
 0x8a6   : > { %v1586_v13 = vpop.xlane.xlu1 %1585 }
 0x8a8   : > { %v1588_v24 = vpop.xlane.xlu0 %1587 }
 0x8b5   : > { %v1463_v10 = vpop.xlane.xlu0 %1462 }
 0x8b6   : > { %v1593_v11 = vrot.slane %v1463_v10, %v2458_v4 }
 0x8b8   : > { %v1595_v15 = vadd.f32 %v1593_v11, %v1586_v13  ;;  %v1596_v18 = vadd.f32 %v1593_v11, %v1588_v24 }
 0x8bd   : > { %v1601_v14 = vpop.permute.xlu0 %1600 }
 0x8be   : > { %v1605_v16 = vrot.slane %v1601_v14, %v2458_v4 }
 0x8c0   : > { %v1607_v17 = vadd.f32 %v1605_v16, %v1595_v15  ;;  %v1608_v19 = vadd.f32 %v1605_v16, %v1596_v18 }
 0x8c2   : > { %1612 = vperm.xlu1 %2089, %v1607_v17  }
 0x8c6   : > { %1615 = vperm.xlu1 %2089, %v1608_v19  }
 0x941   : > { %v1613_v22 = vpop.permute.xlu1 %1612 }
 0x942   : > { %v1622_v26 = vrot.slane %v1613_v22, %v1621_v23 }
 0x945   : > { %v1616_v4 = vpop.permute.xlu1 %1615 }
 0x946   : > { %v1627_v27 = vrot.slane %v1616_v4, %v1626_v25 }
 0x948   : > { %v1629_v0 = vsel %vm1628_vm7, %v1627_v27, %v1622_v26 }
 0x949   : > { %1632 = vst.msk [vmem:[%s288_s14] sm:$0x1] %vm1631_vm8, %v1629_v0 }
 0x94a   : > { %2215 = shalt.err (!%p2212_p11)
}
 0x94b   : > { %s2216_s28 = scalar_lea.hbm %s2692_s17, 16  ;;  %s2220_s15 = scalar_lea.hbm %s2740_s6, 32 }
 0x94c   : > { %p2217_p13 = scmp.ne.s32.totalorder %s2692_s17, %s2216_s28  ;;  %p2221_p6 = scmp.lt.u32.totalorder %s2692_s17, %s2740_s6 }
 0x94d   : > { %p2222_p9 = scmp.lt.u32.totalorder %s2220_s15, %s2216_s28  ;;  %p2224_p12 = scmp.lt.u32.totalorder %s2216_s28, %s2692_s17 }
 0x94e   : > { %p2218_p5 = pnand %p2217_p13, %p2753_p1 }
 0x94f   : > { %p2223_p10 = por %p2222_p9, %p2221_p6 }
 0x950   : > { %p2219_p0 = pneg %p2218_p5 }
 0x951   : > { %p2225_p2 = por %p2224_p12, %p2223_p10 }
 0x953   : > { %p2226_p3 = pnand %p2225_p2, %p2219_p0 }
 0x955   : > { %2229 = shalt.err (!%p2226_p3)
}
 0x956   : > { %2031 = dma.vmem_to_hbm [thread:$0]  (%p2753_p1), %s2694_s29, 16, %s2692_s17, %s1634_s25  }
 0x957 PF: > { %p2048_p4 = scmp.ge.s32.totalorder %s2272_s24, 2  ;;  %s1658_s14 = sand.u32 1, %s2260_s21  }
 0x958   : > { %p2754_p7 = scmp.ne.s32.totalorder %s2745_s8, 0  ;;  %s1659_s10 = scalar_lea.sflag [#allocation4], %s1658_s14 }
 0x95a   : > { %p2041_p8 = pnand %p2048_p4, %p2754_p7 }
 0x95c   : > { %2255 = dma.done.wait (!%p2041_p8), %s1659_s10, 16  }
 0x95d   : > { %2257 = vsyncadd (!%p2041_p8), %s1659_s10, 4294967280  ;;  %p18_p11 = scmp.ge.s32.totalorder %s2342_s27, 4   ;;  %s2755_s21 = smov %s2264_s22 }
 0x95e   : > { %s2756_s22 = smov %s2268_s23  ;;  %s2757_s23 = smov %s2353_s30 }
 0x95f   : > { %s2758_s24 = smov %s2342_s27  ;;  %20 = sbr.rel (!%p18_p11) target bundleno = 5 (0x5), region = 93 }
 0x966   :  { %1663 = vsyncpa [#allocation3], 1 }
 0x967   :  { %1665 = vsyncpa [#allocation3 + $0x1], 1 }
 0x968   :  { %1666 = vsyncpa [#allocation6], 1 }
 0x969   :  { %1667 = vsyncpa [#allocation4], 1 }
 0x96a   :  { %1669 = vsyncpa [#allocation4 + $0x1], 1 }

</bundles_post_ra>
